<compile_context>
chip_gen: v7x
topology: tpu7x:2x2x1
jax: 0.10.0
libtpu: 0.0.40
codegen_flags: <defaults>
</compile_context>

<pallas_src>
import functools

import jax
import jax.numpy as jnp
from jax.experimental import pallas as pl
from jax.experimental.pallas import tpu as pltpu

# ---------------- model hyper-parameters (small, forward-consistent) --------
NUM_CLASSES = 15
NUM_QUERIES = 2
B = 2               # batch
C_IN = 3            # RGB
IMG = 32            # spatial
PATCH = 8           # backbone "conv" kernel = stride
C_BACK = 64         # synthetic backbone channels
D_MODEL = 32        # transformer hidden
NHEAD = 4
D_HEAD = D_MODEL // NHEAD
DIM_FF = 64
HP = IMG // PATCH                       # 4
L_TOK = HP * HP                         # 16 tokens per image
N_TOK = B * L_TOK                       # 32 encoder tokens
N_QROWS = ((B * NUM_QUERIES + 7) // 8) * 8   # query rows padded to 8 (sublane-dense)
OUT_PAD = 128                           # lane-dense output width: logits|boxes|zeros
SLAB_W = 128                            # lane width of parameter slabs


# ============================ parameter slab packing =========================
class _SlabBuilder:
    """Packs many small parameter arrays row-wise into one lane-dense slab."""

    def __init__(self, width=SLAB_W):
        self.width = width
        self.blocks = []
        self.offsets = {}
        self.rows = 0

    def add(self, name, arr):
        arr = jnp.asarray(arr, jnp.float32)
        if arr.ndim == 1:
            arr = arr.reshape(1, -1)
        r, c = arr.shape
        assert c <= self.width, (name, arr.shape)
        self.offsets[name] = (self.rows, r, c)
        self.blocks.append(jnp.pad(arr, ((0, 0), (0, self.width - c))))
        self.rows += r

    def finish(self):
        slab = jnp.concatenate(self.blocks, axis=0)
        pad = (-self.rows) % 8
        if pad:
            slab = jnp.pad(slab, ((0, pad), (0, 0)))
        return slab, self.offsets


# ============================ fused Pallas kernel body =======================
def _fused_forward_kernel(x_ref, w_ref, c_ref, out_ref, *, w_off, c_off):
    """Whole DETR forward on VMEM-resident tensors.

    x_ref  : (N_TOK, C_IN*PATCH*PATCH) patchified images.
    w_ref  : (Rw, 128) weight slab (matmul RHS matrices, static row offsets).
    c_ref  : (Rc, 128) constant slab (biases, LN params, folded pos/bias
             constants, attention masks, head lane masks).
    out_ref: (N_QROWS, 128) = [logits(16) | boxes(4) | zeros(108)].
    """
    f32 = jnp.float32

    def W(name):
        r, nr, nc = w_off[name]
        return w_ref[r:r + nr, :nc]

    def C(name):
        r, nr, nc = c_off[name]
        return c_ref[r:r + nr, :nc]

    def dot(a, b):
        return jnp.dot(a, b, preferred_element_type=f32)

    def ln(x, g, b, eps=1e-5):
        mu = jnp.mean(x, axis=-1, keepdims=True)
        var = jnp.mean(jnp.square(x - mu), axis=-1, keepdims=True)
        return (x - mu) * jax.lax.rsqrt(var + eps) * g + b

    def softmax_rows(s):
        s = s - jnp.max(s, axis=-1, keepdims=True)
        e = jnp.exp(s)
        # divide via EUP approx reciprocal (VALU stays free)
        return e * pl.reciprocal(jnp.sum(e, axis=-1, keepdims=True), approx=True)

    hmasks = C("head_masks")                       # (NHEAD, D_MODEL) 0/1

    def heads_attn(q, k, v, attn_mask):
        # No lane slicing / concat: per-head scores via lane-masked q (VPU mul),
        # per-head outputs lane-masked and summed.
        scale = 1.0 / (D_HEAD ** 0.5)
        out = jnp.zeros((q.shape[0], D_MODEL), f32)
        for h in range(NHEAD):
            hm = hmasks[h:h + 1, :]                                   # (1, D)
            s = jax.lax.dot_general(q * hm, k, (((1,), (1,)), ((), ())),
                                    preferred_element_type=f32) * scale
            p = softmax_rows(s + attn_mask)
            out = out + hm * dot(p, v)
        return out

    # ---------------- backbone "conv" + 1x1 input_proj ----------------------
    x = x_ref[...]                                                    # (N_TOK, 192)
    feat = jnp.maximum(dot(x, W("backbone_w")) + C("backbone_b"), 0.0)
    src = dot(feat, W("proj_w")) + C("proj_b")                        # (N_TOK, D)

    # ---------------- encoder layer (post-norm, DETR style) -----------------
    # q|k|v in one dot; pos@Wq+bq | pos@Wk+bk | bv folded into constant slab.
    qkv = dot(src, W("enc_wqkv")) + C("enc_cqkv")                     # (N_TOK, 3D)
    q = qkv[:, 0:D_MODEL]
    k = qkv[:, D_MODEL:2 * D_MODEL]
    v = qkv[:, 2 * D_MODEL:3 * D_MODEL]
    attn = heads_attn(q, k, v, C("m_enc"))
    src = ln(src + dot(attn, W("enc_wo")) + C("enc_bo"),
             C("enc_n1_g"), C("enc_n1_b"))
    ff = jnp.maximum(dot(src, W("enc_lin1")) + C("enc_b1"), 0.0)
    memory = ln(src + dot(ff, W("enc_lin2")) + C("enc_b2"),
                C("enc_n2_g"), C("enc_n2_b"))                         # (N_TOK, D)

    # ---------------- decoder layer (post-norm, DETR style) -----------------
    # Decoder self-attention with tgt == 0 is the host-folded constant tgt_sa;
    # its cross-attention queries (tgt_sa + query_pos) @ Wq + bq are q_cross.
    tgt_sa = C("tgt_sa")                                              # (N_QROWS, D)
    kv = dot(memory, W("dec_wkv")) + C("dec_ckv")                     # (N_TOK, 2D)
    k_c = kv[:, 0:D_MODEL]
    v_c = kv[:, D_MODEL:2 * D_MODEL]
    attn = heads_attn(C("q_cross"), k_c, v_c, C("m_cross"))           # (N_QROWS, D)
    tgt = ln(tgt_sa + dot(attn, W("dec_wo")) + C("dec_bo"),
             C("dec_n2_g"), C("dec_n2_b"))
    ff = jnp.maximum(dot(tgt, W("dec_lin1")) + C("dec_b1"), 0.0)
    tgt = ln(tgt + dot(ff, W("dec_lin2")) + C("dec_b2"),
             C("dec_n3_g"), C("dec_n3_b"))
    hs = ln(tgt, C("dec_norm_g"), C("dec_norm_b"))                    # (N_QROWS, D)

    # ---------------- heads (class + first bbox-MLP layer fused) ------------
    nc1 = NUM_CLASSES + 1
    hb = dot(hs, W("head_w")) + C("head_b")                           # (N_QROWS, 48)
    logits = hb[:, :nc1]
    h1 = jnp.maximum(hb[:, nc1:nc1 + D_MODEL], 0.0)
    h2 = jnp.maximum(dot(h1, W("bbox_w2")) + C("bbox_b2"), 0.0)
    boxes = jax.nn.sigmoid(dot(h2, W("bbox_w3")) + C("bbox_b3"))      # (N_QROWS, 4)

    pad = jnp.zeros((N_QROWS, OUT_PAD - nc1 - 4), f32)
    out_ref[...] = jnp.concatenate([logits, boxes, pad], axis=-1)     # one dense store


# ============================ wrapper (one pallas_call) ======================
def make_detr_forward(w_off, c_off):
    kernel = functools.partial(_fused_forward_kernel, w_off=w_off, c_off=c_off)
    vmem = pl.BlockSpec(memory_space=pltpu.MemorySpace.VMEM)

    @jax.jit
    def fwd(w_slab, c_slab, images):
        # images: (B, C, H, W) -- NCHW like PyTorch
        Bi, Ci, H, Wd = images.shape
        assert Bi == B and Ci == C_IN and H == IMG and Wd == IMG
        # im2col patchify (backbone conv with kernel=stride=PATCH, no pad).
        x = images.reshape(Bi, Ci, HP, PATCH, HP, PATCH)
        x = x.transpose(0, 2, 4, 1, 3, 5).reshape(Bi * L_TOK, Ci * PATCH * PATCH)

        out = pl.pallas_call(
            kernel,
            out_shape=jax.ShapeDtypeStruct((N_QROWS, OUT_PAD), jnp.float32),
            in_specs=[vmem, vmem, vmem],
            out_specs=vmem,
        )(x, w_slab, c_slab)

        nc1 = NUM_CLASSES + 1
        n_q = Bi * NUM_QUERIES
        logits = out[:n_q, :nc1].reshape(Bi, NUM_QUERIES, nc1)
        boxes = out[:n_q, nc1:nc1 + 4].reshape(Bi, NUM_QUERIES, 4)
        return {"pred_logits": logits, "pred_boxes": boxes}

    return fwd


# ============================ deterministic init =============================
def init_params(seed=0):
    key = jax.random.PRNGKey(seed)
    ks = iter(jax.random.split(key, 64))

    def dense(k_in, k_out, scale=0.02):
        return scale * jax.random.normal(next(ks), (k_in, k_out), jnp.float32)

    def zeros(n):
        return jnp.zeros((n,), jnp.float32)

    def attn_params():
        return {
            "wq": dense(D_MODEL, D_MODEL), "bq": zeros(D_MODEL),
            "wk": dense(D_MODEL, D_MODEL), "bk": zeros(D_MODEL),
            "wv": dense(D_MODEL, D_MODEL), "bv": zeros(D_MODEL),
            "wo": dense(D_MODEL, D_MODEL), "bo": zeros(D_MODEL),
        }

    return {
        "backbone_w": dense(C_IN * PATCH * PATCH, C_BACK),
        "backbone_b": zeros(C_BACK),
        "proj_w": dense(C_BACK, D_MODEL),
        "proj_b": zeros(D_MODEL),
        "pos_embed": 0.02 * jax.random.normal(next(ks), (L_TOK, D_MODEL), jnp.float32),
        "query_embed": 0.02 * jax.random.normal(next(ks), (NUM_QUERIES, D_MODEL), jnp.float32),
        "enc": {
            "self_attn": attn_params(),
            "lin1_w": dense(D_MODEL, DIM_FF), "lin1_b": zeros(DIM_FF),
            "lin2_w": dense(DIM_FF, D_MODEL), "lin2_b": zeros(D_MODEL),
            "norm1_g": jnp.ones((D_MODEL,), jnp.float32), "norm1_b": zeros(D_MODEL),
            "norm2_g": jnp.ones((D_MODEL,), jnp.float32), "norm2_b": zeros(D_MODEL),
        },
        "dec": {
            "self_attn": attn_params(),
            "cross_attn": attn_params(),
            "lin1_w": dense(D_MODEL, DIM_FF), "lin1_b": zeros(DIM_FF),
            "lin2_w": dense(DIM_FF, D_MODEL), "lin2_b": zeros(D_MODEL),
            "norm1_g": jnp.ones((D_MODEL,), jnp.float32), "norm1_b": zeros(D_MODEL),
            "norm2_g": jnp.ones((D_MODEL,), jnp.float32), "norm2_b": zeros(D_MODEL),
            "norm3_g": jnp.ones((D_MODEL,), jnp.float32), "norm3_b": zeros(D_MODEL),
        },
        "dec_norm_g": jnp.ones((D_MODEL,), jnp.float32),
        "dec_norm_b": zeros(D_MODEL),
        "class_w": dense(D_MODEL, NUM_CLASSES + 1), "class_b": zeros(NUM_CLASSES + 1),
        "bbox_w1": dense(D_MODEL, D_MODEL), "bbox_b1": zeros(D_MODEL),
        "bbox_w2": dense(D_MODEL, D_MODEL), "bbox_b2": zeros(D_MODEL),
        "bbox_w3": dense(D_MODEL, 4), "bbox_b3": zeros(4),
    }


def pack_params(params):
    """One-time host repack into two lane-dense slabs.

    Fuses q|k|v weights, class|bbox1 weights, folds positional-embedding
    projections + biases into additive constants, analytically folds the
    zero-input decoder self-attention, and precomputes all masks."""
    def row(v):
        return jnp.asarray(v, jnp.float32).reshape(1, -1)

    def ln_host(x, g, b, eps=1e-5):
        mu = jnp.mean(x, axis=-1, keepdims=True)
        var = jnp.mean(jnp.square(x - mu), axis=-1, keepdims=True)
        return (x - mu) * jax.lax.rsqrt(var + eps) * g + b

    enc, dec = params["enc"], params["dec"]
    esa, dsa, dca = enc["self_attn"], dec["self_attn"], dec["cross_attn"]

    pos = jnp.tile(params["pos_embed"], (B, 1))                      # (N_TOK, D)
    qpos = jnp.tile(params["query_embed"], (B, 1))                   # (B*NQ, D)
    qpos = jnp.pad(qpos, ((0, N_QROWS - B * NUM_QUERIES), (0, 0)))   # (N_QROWS, D)

    # ---- encoder fused q|k|v weight + folded additive constant -------------
    enc_wqkv = jnp.concatenate([esa["wq"], esa["wk"], esa["wv"]], axis=1)
    enc_cqkv = jnp.concatenate(
        [pos @ esa["wq"] + esa["bq"],
         pos @ esa["wk"] + esa["bk"],
         jnp.tile(row(esa["bv"]), (N_TOK, 1))], axis=1)

    # ---- decoder self-attention folded analytically (tgt == 0) -------------
    tgt_sa_row = ln_host(row(dsa["bv"]) @ dsa["wo"] + dsa["bo"],
                         dec["norm1_g"], dec["norm1_b"])
    tgt_sa = jnp.tile(tgt_sa_row, (N_QROWS, 1))
    q_cross = (tgt_sa + qpos) @ dca["wq"] + dca["bq"]

    # ---- decoder cross-attention fused k|v + folded constant ---------------
    dec_wkv = jnp.concatenate([dca["wk"], dca["wv"]], axis=1)
    dec_ckv = jnp.concatenate(
        [pos @ dca["wk"] + dca["bk"],
         jnp.tile(row(dca["bv"]), (N_TOK, 1))], axis=1)

    # ---- class head + first bbox-MLP layer fused ----------------------------
    head_w = jnp.concatenate([params["class_w"], params["bbox_w1"]], axis=1)
    head_b = jnp.concatenate([params["class_b"], params["bbox_b1"]], axis=0)

    # ---- host-precomputed masks ---------------------------------------------
    ti = jnp.arange(N_TOK) // L_TOK
    m_enc = jnp.where(ti[:, None] == ti[None, :], 0.0, -1e9).astype(jnp.float32)
    qi = jnp.arange(N_QROWS) // NUM_QUERIES
    m_cross = jnp.where(qi[:, None] == ti[None, :], 0.0, -1e9).astype(jnp.float32)
    head_masks = (jnp.arange(D_MODEL)[None, :] // D_HEAD ==
                  jnp.arange(NHEAD)[:, None]).astype(jnp.float32)

    # ---- weight slab ---------------------------------------------------------
    wb = _SlabBuilder()
    wb.add("backbone_w", params["backbone_w"])
    wb.add("proj_w", params["proj_w"])
    wb.add("enc_wqkv", enc_wqkv)
    wb.add("enc_wo", esa["wo"])
    wb.add("enc_lin1", enc["lin1_w"])
    wb.add("enc_lin2", enc["lin2_w"])
    wb.add("dec_wkv", dec_wkv)
    wb.add("dec_wo", dca["wo"])
    wb.add("dec_lin1", dec["lin1_w"])
    wb.add("dec_lin2", dec["lin2_w"])
    wb.add("head_w", head_w)
    wb.add("bbox_w2", params["bbox_w2"])
    wb.add("bbox_w3", params["bbox_w3"])
    w_slab, w_off = wb.finish()

    # ---- constant slab -------------------------------------------------------
    cb = _SlabBuilder()
    cb.add("backbone_b", params["backbone_b"])
    cb.add("proj_b", params["proj_b"])
    cb.add("enc_cqkv", enc_cqkv)
    cb.add("enc_bo", esa["bo"])
    cb.add("enc_n1_g", enc["norm1_g"])
    cb.add("enc_n1_b", enc["norm1_b"])
    cb.add("enc_b1", enc["lin1_b"])
    cb.add("enc_b2", enc["lin2_b"])
    cb.add("enc_n2_g", enc["norm2_g"])
    cb.add("enc_n2_b", enc["norm2_b"])
    cb.add("m_enc", m_enc)
    cb.add("tgt_sa", tgt_sa)
    cb.add("q_cross", q_cross)
    cb.add("dec_ckv", dec_ckv)
    cb.add("dec_bo", dca["bo"])
    cb.add("dec_n2_g", dec["norm2_g"])
    cb.add("dec_n2_b", dec["norm2_b"])
    cb.add("dec_b1", dec["lin1_b"])
    cb.add("dec_b2", dec["lin2_b"])
    cb.add("dec_n3_g", dec["norm3_g"])
    cb.add("dec_n3_b", dec["norm3_b"])
    cb.add("m_cross", m_cross)
    cb.add("dec_norm_g", params["dec_norm_g"])
    cb.add("dec_norm_b", params["dec_norm_b"])
    cb.add("head_b", head_b)
    cb.add("bbox_b2", params["bbox_b2"])
    cb.add("bbox_b3", params["bbox_b3"])
    cb.add("head_masks", head_masks)
    c_slab, c_off = cb.finish()

    return w_slab, w_off, c_slab, c_off


# ================================== main =====================================
if __name__ == "__main__":
    params = init_params(seed=0)
    w_slab, w_off, c_slab, c_off = pack_params(params)
    detr_forward = make_detr_forward(w_off, c_off)

    images = jax.random.normal(jax.random.PRNGKey(0), (B, C_IN, IMG, IMG), jnp.float32)

    out = detr_forward(w_slab, c_slab, images)
    jax.block_until_ready(out)

    assert out["pred_logits"].shape == (B, NUM_QUERIES, NUM_CLASSES + 1)
    assert out["pred_boxes"].shape == (B, NUM_QUERIES, 4)
    assert bool(jnp.all(jnp.isfinite(out["pred_logits"])))
    assert bool(jnp.all((out["pred_boxes"] >= 0.0) & (out["pred_boxes"] <= 1.0)))

    print("KERNEL_OK")
</pallas_src>

<mosaic_0001>
module attributes {stable_mosaic.version = 11 : i64} {
  func.func @_fused_forward_kernel(%arg0: memref<32x192xf32, #tpu.memory_space<vmem>>, %arg1: memref<672x128xf32, #tpu.memory_space<vmem>>, %arg2: memref<152x128xf32, #tpu.memory_space<vmem>>, %arg3: memref<8x128xf32, #tpu.memory_space<vmem>>) attributes {dimension_semantics = [], scalar_prefetch = 0 : i64, scratch_operands = 0 : i64, tpu.core_type = #tpu.core_type<tc>} {
    %c141 = arith.constant 141 : index
    %c0 = arith.constant 0 : index
    %0 = vector.load %arg2[%c141, %c0] : memref<152x128xf32, #tpu.memory_space<vmem>>, vector<4x32xf32>
    %c0_0 = arith.constant 0 : index
    %c0_1 = arith.constant 0 : index
    %1 = vector.load %arg0[%c0_0, %c0_1] : memref<32x192xf32, #tpu.memory_space<vmem>>, vector<32x192xf32>
    %c0_2 = arith.constant 0 : index
    %c0_3 = arith.constant 0 : index
    %2 = vector.load %arg1[%c0_2, %c0_3] : memref<672x128xf32, #tpu.memory_space<vmem>>, vector<192x64xf32>
    %cst = arith.constant dense<0.000000e+00> : vector<32x64xf32>
    %3 = tpu.matmul %1, %2, %cst {dimension_numbers = #tpu.dot_dimension_numbers<[1], [0], [0], [1], [0, 0, 1, 1], [], []>} : vector<32x192xf32>, vector<192x64xf32>, vector<32x64xf32> -> vector<32x64xf32>
    %c0_4 = arith.constant 0 : index
    %c0_5 = arith.constant 0 : index
    %4 = vector.load %arg2[%c0_4, %c0_5] : memref<152x128xf32, #tpu.memory_space<vmem>>, vector<1x64xf32>
    %5 = vector.broadcast %4 : vector<1x64xf32> to vector<32x64xf32>
    %6 = arith.addf %3, %5 : vector<32x64xf32>
    %cst_6 = arith.constant 0.000000e+00 : f32
    %7 = vector.broadcast %cst_6 : f32 to vector<32x64xf32>
    %8 = arith.maximumf %6, %7 : vector<32x64xf32>
    %c192 = arith.constant 192 : index
    %c0_7 = arith.constant 0 : index
    %9 = vector.load %arg1[%c192, %c0_7] : memref<672x128xf32, #tpu.memory_space<vmem>>, vector<64x32xf32>
    %cst_8 = arith.constant dense<0.000000e+00> : vector<32x32xf32>
    %10 = tpu.matmul %8, %9, %cst_8 {dimension_numbers = #tpu.dot_dimension_numbers<[1], [0], [0], [1], [0, 0, 1, 1], [], []>} : vector<32x64xf32>, vector<64x32xf32>, vector<32x32xf32> -> vector<32x32xf32>
    %c1 = arith.constant 1 : index
    %c0_9 = arith.constant 0 : index
    %11 = vector.load %arg2[%c1, %c0_9] : memref<152x128xf32, #tpu.memory_space<vmem>>, vector<1x32xf32>
    %12 = vector.broadcast %11 : vector<1x32xf32> to vector<32x32xf32>
    %13 = arith.addf %10, %12 : vector<32x32xf32>
    %c256 = arith.constant 256 : index
    %c0_10 = arith.constant 0 : index
    %14 = vector.load %arg1[%c256, %c0_10] : memref<672x128xf32, #tpu.memory_space<vmem>>, vector<32x96xf32>
    %cst_11 = arith.constant dense<0.000000e+00> : vector<32x96xf32>
    %15 = tpu.matmul %13, %14, %cst_11 {dimension_numbers = #tpu.dot_dimension_numbers<[1], [0], [0], [1], [0, 0, 1, 1], [], []>} : vector<32x32xf32>, vector<32x96xf32>, vector<32x96xf32> -> vector<32x96xf32>
    %c2 = arith.constant 2 : index
    %c0_12 = arith.constant 0 : index
    %16 = vector.load %arg2[%c2, %c0_12] : memref<152x128xf32, #tpu.memory_space<vmem>>, vector<32x96xf32>
    %17 = arith.addf %15, %16 : vector<32x96xf32>
    %18 = vector.extract_strided_slice %17 {offsets = [0, 0], sizes = [32, 32], strides = [1, 1]} : vector<32x96xf32> to vector<32x32xf32>
    %19 = vector.extract_strided_slice %17 {offsets = [0, 32], sizes = [32, 32], strides = [1, 1]} : vector<32x96xf32> to vector<32x32xf32>
    %20 = vector.extract_strided_slice %17 {offsets = [0, 64], sizes = [32, 32], strides = [1, 1]} : vector<32x96xf32> to vector<32x32xf32>
    %c41 = arith.constant 41 : index
    %c0_13 = arith.constant 0 : index
    %21 = vector.load %arg2[%c41, %c0_13] : memref<152x128xf32, #tpu.memory_space<vmem>>, vector<32x32xf32>
    %cst_14 = arith.constant 0.000000e+00 : f32
    %22 = vector.broadcast %cst_14 : f32 to vector<32x32xf32>
    %23 = vector.extract_strided_slice %0 {offsets = [0, 0], sizes = [1, 32], strides = [1, 1]} : vector<4x32xf32> to vector<1x32xf32>
    %24 = vector.broadcast %23 : vector<1x32xf32> to vector<32x32xf32>
    %25 = arith.mulf %18, %24 : vector<32x32xf32>
    %cst_15 = arith.constant dense<0.000000e+00> : vector<32x32xf32>
    %26 = tpu.matmul %25, %19, %cst_15 {dimension_numbers = #tpu.dot_dimension_numbers<[1], [1], [0], [0], [0, 0, 1, 0], [], []>} : vector<32x32xf32>, vector<32x32xf32>, vector<32x32xf32> -> vector<32x32xf32>
    %cst_16 = arith.constant 0.353553385 : f32
    %27 = vector.broadcast %cst_16 : f32 to vector<32x32xf32>
    %28 = arith.mulf %26, %27 : vector<32x32xf32>
    %29 = arith.addf %28, %21 : vector<32x32xf32>
    %cst_17 = arith.constant dense<0xFF800000> : vector<32xf32>
    %30 = vector.multi_reduction <maximumf>, %29, %cst_17 [1] : vector<32x32xf32> to vector<32xf32>
    %31 = vector.shape_cast %30 : vector<32xf32> to vector<32x1xf32>
    %32 = vector.broadcast %31 : vector<32x1xf32> to vector<32x32xf32>
    %33 = arith.subf %29, %32 : vector<32x32xf32>
    %34 = math.exp %33 : vector<32x32xf32>
    %cst_18 = arith.constant dense<0.000000e+00> : vector<32xf32>
    %35 = vector.multi_reduction <add>, %34, %cst_18 [1] : vector<32x32xf32> to vector<32xf32>
    %36 = vector.shape_cast %35 : vector<32xf32> to vector<32x1xf32>
    %37 = tpu.reciprocal %36 {approx = true} : vector<32x1xf32> -> vector<32x1xf32>
    %38 = vector.broadcast %37 : vector<32x1xf32> to vector<32x32xf32>
    %39 = arith.mulf %34, %38 : vector<32x32xf32>
    %cst_19 = arith.constant dense<0.000000e+00> : vector<32x32xf32>
    %40 = tpu.matmul %39, %20, %cst_19 {dimension_numbers = #tpu.dot_dimension_numbers<[1], [0], [0], [1], [0, 0, 1, 1], [], []>} : vector<32x32xf32>, vector<32x32xf32>, vector<32x32xf32> -> vector<32x32xf32>
    %41 = vector.broadcast %23 : vector<1x32xf32> to vector<32x32xf32>
    %42 = arith.mulf %41, %40 : vector<32x32xf32>
    %43 = arith.addf %22, %42 : vector<32x32xf32>
    %44 = vector.extract_strided_slice %0 {offsets = [1, 0], sizes = [1, 32], strides = [1, 1]} : vector<4x32xf32> to vector<1x32xf32>
    %45 = vector.broadcast %44 : vector<1x32xf32> to vector<32x32xf32>
    %46 = arith.mulf %18, %45 : vector<32x32xf32>
    %cst_20 = arith.constant dense<0.000000e+00> : vector<32x32xf32>
    %47 = tpu.matmul %46, %19, %cst_20 {dimension_numbers = #tpu.dot_dimension_numbers<[1], [1], [0], [0], [0, 0, 1, 0], [], []>} : vector<32x32xf32>, vector<32x32xf32>, vector<32x32xf32> -> vector<32x32xf32>
    %cst_21 = arith.constant 0.353553385 : f32
    %48 = vector.broadcast %cst_21 : f32 to vector<32x32xf32>
    %49 = arith.mulf %47, %48 : vector<32x32xf32>
    %50 = arith.addf %49, %21 : vector<32x32xf32>
    %cst_22 = arith.constant dense<0xFF800000> : vector<32xf32>
    %51 = vector.multi_reduction <maximumf>, %50, %cst_22 [1] : vector<32x32xf32> to vector<32xf32>
    %52 = vector.shape_cast %51 : vector<32xf32> to vector<32x1xf32>
    %53 = vector.broadcast %52 : vector<32x1xf32> to vector<32x32xf32>
    %54 = arith.subf %50, %53 : vector<32x32xf32>
    %55 = math.exp %54 : vector<32x32xf32>
    %cst_23 = arith.constant dense<0.000000e+00> : vector<32xf32>
    %56 = vector.multi_reduction <add>, %55, %cst_23 [1] : vector<32x32xf32> to vector<32xf32>
    %57 = vector.shape_cast %56 : vector<32xf32> to vector<32x1xf32>
    %58 = tpu.reciprocal %57 {approx = true} : vector<32x1xf32> -> vector<32x1xf32>
    %59 = vector.broadcast %58 : vector<32x1xf32> to vector<32x32xf32>
    %60 = arith.mulf %55, %59 : vector<32x32xf32>
    %cst_24 = arith.constant dense<0.000000e+00> : vector<32x32xf32>
    %61 = tpu.matmul %60, %20, %cst_24 {dimension_numbers = #tpu.dot_dimension_numbers<[1], [0], [0], [1], [0, 0, 1, 1], [], []>} : vector<32x32xf32>, vector<32x32xf32>, vector<32x32xf32> -> vector<32x32xf32>
    %62 = vector.broadcast %44 : vector<1x32xf32> to vector<32x32xf32>
    %63 = arith.mulf %62, %61 : vector<32x32xf32>
    %64 = arith.addf %43, %63 : vector<32x32xf32>
    %65 = vector.extract_strided_slice %0 {offsets = [2, 0], sizes = [1, 32], strides = [1, 1]} : vector<4x32xf32> to vector<1x32xf32>
    %66 = vector.broadcast %65 : vector<1x32xf32> to vector<32x32xf32>
    %67 = arith.mulf %18, %66 : vector<32x32xf32>
    %cst_25 = arith.constant dense<0.000000e+00> : vector<32x32xf32>
    %68 = tpu.matmul %67, %19, %cst_25 {dimension_numbers = #tpu.dot_dimension_numbers<[1], [1], [0], [0], [0, 0, 1, 0], [], []>} : vector<32x32xf32>, vector<32x32xf32>, vector<32x32xf32> -> vector<32x32xf32>
    %cst_26 = arith.constant 0.353553385 : f32
    %69 = vector.broadcast %cst_26 : f32 to vector<32x32xf32>
    %70 = arith.mulf %68, %69 : vector<32x32xf32>
    %71 = arith.addf %70, %21 : vector<32x32xf32>
    %cst_27 = arith.constant dense<0xFF800000> : vector<32xf32>
    %72 = vector.multi_reduction <maximumf>, %71, %cst_27 [1] : vector<32x32xf32> to vector<32xf32>
    %73 = vector.shape_cast %72 : vector<32xf32> to vector<32x1xf32>
    %74 = vector.broadcast %73 : vector<32x1xf32> to vector<32x32xf32>
    %75 = arith.subf %71, %74 : vector<32x32xf32>
    %76 = math.exp %75 : vector<32x32xf32>
    %cst_28 = arith.constant dense<0.000000e+00> : vector<32xf32>
    %77 = vector.multi_reduction <add>, %76, %cst_28 [1] : vector<32x32xf32> to vector<32xf32>
    %78 = vector.shape_cast %77 : vector<32xf32> to vector<32x1xf32>
    %79 = tpu.reciprocal %78 {approx = true} : vector<32x1xf32> -> vector<32x1xf32>
    %80 = vector.broadcast %79 : vector<32x1xf32> to vector<32x32xf32>
    %81 = arith.mulf %76, %80 : vector<32x32xf32>
    %cst_29 = arith.constant dense<0.000000e+00> : vector<32x32xf32>
    %82 = tpu.matmul %81, %20, %cst_29 {dimension_numbers = #tpu.dot_dimension_numbers<[1], [0], [0], [1], [0, 0, 1, 1], [], []>} : vector<32x32xf32>, vector<32x32xf32>, vector<32x32xf32> -> vector<32x32xf32>
    %83 = vector.broadcast %65 : vector<1x32xf32> to vector<32x32xf32>
    %84 = arith.mulf %83, %82 : vector<32x32xf32>
    %85 = arith.addf %64, %84 : vector<32x32xf32>
    %86 = vector.extract_strided_slice %0 {offsets = [3, 0], sizes = [1, 32], strides = [1, 1]} : vector<4x32xf32> to vector<1x32xf32>
    %87 = vector.broadcast %86 : vector<1x32xf32> to vector<32x32xf32>
    %88 = arith.mulf %18, %87 : vector<32x32xf32>
    %cst_30 = arith.constant dense<0.000000e+00> : vector<32x32xf32>
    %89 = tpu.matmul %88, %19, %cst_30 {dimension_numbers = #tpu.dot_dimension_numbers<[1], [1], [0], [0], [0, 0, 1, 0], [], []>} : vector<32x32xf32>, vector<32x32xf32>, vector<32x32xf32> -> vector<32x32xf32>
    %cst_31 = arith.constant 0.353553385 : f32
    %90 = vector.broadcast %cst_31 : f32 to vector<32x32xf32>
    %91 = arith.mulf %89, %90 : vector<32x32xf32>
    %92 = arith.addf %91, %21 : vector<32x32xf32>
    %cst_32 = arith.constant dense<0xFF800000> : vector<32xf32>
    %93 = vector.multi_reduction <maximumf>, %92, %cst_32 [1] : vector<32x32xf32> to vector<32xf32>
    %94 = vector.shape_cast %93 : vector<32xf32> to vector<32x1xf32>
    %95 = vector.broadcast %94 : vector<32x1xf32> to vector<32x32xf32>
    %96 = arith.subf %92, %95 : vector<32x32xf32>
    %97 = math.exp %96 : vector<32x32xf32>
    %cst_33 = arith.constant dense<0.000000e+00> : vector<32xf32>
    %98 = vector.multi_reduction <add>, %97, %cst_33 [1] : vector<32x32xf32> to vector<32xf32>
    %99 = vector.shape_cast %98 : vector<32xf32> to vector<32x1xf32>
    %100 = tpu.reciprocal %99 {approx = true} : vector<32x1xf32> -> vector<32x1xf32>
    %101 = vector.broadcast %100 : vector<32x1xf32> to vector<32x32xf32>
    %102 = arith.mulf %97, %101 : vector<32x32xf32>
    %cst_34 = arith.constant dense<0.000000e+00> : vector<32x32xf32>
    %103 = tpu.matmul %102, %20, %cst_34 {dimension_numbers = #tpu.dot_dimension_numbers<[1], [0], [0], [1], [0, 0, 1, 1], [], []>} : vector<32x32xf32>, vector<32x32xf32>, vector<32x32xf32> -> vector<32x32xf32>
    %104 = vector.broadcast %86 : vector<1x32xf32> to vector<32x32xf32>
    %105 = arith.mulf %104, %103 : vector<32x32xf32>
    %106 = arith.addf %85, %105 : vector<32x32xf32>
    %c288 = arith.constant 288 : index
    %c0_35 = arith.constant 0 : index
    %107 = vector.load %arg1[%c288, %c0_35] : memref<672x128xf32, #tpu.memory_space<vmem>>, vector<32x32xf32>
    %cst_36 = arith.constant dense<0.000000e+00> : vector<32x32xf32>
    %108 = tpu.matmul %106, %107, %cst_36 {dimension_numbers = #tpu.dot_dimension_numbers<[1], [0], [0], [1], [0, 0, 1, 1], [], []>} : vector<32x32xf32>, vector<32x32xf32>, vector<32x32xf32> -> vector<32x32xf32>
    %109 = arith.addf %13, %108 : vector<32x32xf32>
    %c34 = arith.constant 34 : index
    %c0_37 = arith.constant 0 : index
    %110 = vector.load %arg2[%c34, %c0_37] : memref<152x128xf32, #tpu.memory_space<vmem>>, vector<1x32xf32>
    %111 = vector.broadcast %110 : vector<1x32xf32> to vector<32x32xf32>
    %112 = arith.addf %109, %111 : vector<32x32xf32>
    %c35 = arith.constant 35 : index
    %c0_38 = arith.constant 0 : index
    %113 = vector.load %arg2[%c35, %c0_38] : memref<152x128xf32, #tpu.memory_space<vmem>>, vector<1x32xf32>
    %c36 = arith.constant 36 : index
    %c0_39 = arith.constant 0 : index
    %114 = vector.load %arg2[%c36, %c0_39] : memref<152x128xf32, #tpu.memory_space<vmem>>, vector<1x32xf32>
    %cst_40 = arith.constant dense<0.000000e+00> : vector<32xf32>
    %115 = vector.multi_reduction <add>, %112, %cst_40 [1] : vector<32x32xf32> to vector<32xf32>
    %116 = vector.shape_cast %115 : vector<32xf32> to vector<32x1xf32>
    %cst_41 = arith.constant 3.200000e+01 : f32
    %117 = vector.broadcast %cst_41 : f32 to vector<32x1xf32>
    %118 = arith.divf %116, %117 : vector<32x1xf32>
    %119 = vector.broadcast %118 : vector<32x1xf32> to vector<32x32xf32>
    %120 = arith.subf %112, %119 : vector<32x32xf32>
    %121 = arith.mulf %120, %120 : vector<32x32xf32>
    %cst_42 = arith.constant dense<0.000000e+00> : vector<32xf32>
    %122 = vector.multi_reduction <add>, %121, %cst_42 [1] : vector<32x32xf32> to vector<32xf32>
    %123 = vector.shape_cast %122 : vector<32xf32> to vector<32x1xf32>
    %cst_43 = arith.constant 3.200000e+01 : f32
    %124 = vector.broadcast %cst_43 : f32 to vector<32x1xf32>
    %125 = arith.divf %123, %124 : vector<32x1xf32>
    %126 = vector.broadcast %118 : vector<32x1xf32> to vector<32x32xf32>
    %127 = arith.subf %112, %126 : vector<32x32xf32>
    %cst_44 = arith.constant 9.99999974E-6 : f32
    %128 = vector.broadcast %cst_44 : f32 to vector<32x1xf32>
    %129 = arith.addf %125, %128 : vector<32x1xf32>
    %130 = math.rsqrt %129 : vector<32x1xf32>
    %131 = vector.broadcast %130 : vector<32x1xf32> to vector<32x32xf32>
    %132 = arith.mulf %127, %131 : vector<32x32xf32>
    %133 = vector.broadcast %113 : vector<1x32xf32> to vector<32x32xf32>
    %134 = arith.mulf %132, %133 : vector<32x32xf32>
    %135 = vector.broadcast %114 : vector<1x32xf32> to vector<32x32xf32>
    %136 = arith.addf %134, %135 : vector<32x32xf32>
    %c320 = arith.constant 320 : index
    %c0_45 = arith.constant 0 : index
    %137 = vector.load %arg1[%c320, %c0_45] : memref<672x128xf32, #tpu.memory_space<vmem>>, vector<32x64xf32>
    %cst_46 = arith.constant dense<0.000000e+00> : vector<32x64xf32>
    %138 = tpu.matmul %136, %137, %cst_46 {dimension_numbers = #tpu.dot_dimension_numbers<[1], [0], [0], [1], [0, 0, 1, 1], [], []>} : vector<32x32xf32>, vector<32x64xf32>, vector<32x64xf32> -> vector<32x64xf32>
    %c37 = arith.constant 37 : index
    %c0_47 = arith.constant 0 : index
    %139 = vector.load %arg2[%c37, %c0_47] : memref<152x128xf32, #tpu.memory_space<vmem>>, vector<1x64xf32>
    %140 = vector.broadcast %139 : vector<1x64xf32> to vector<32x64xf32>
    %141 = arith.addf %138, %140 : vector<32x64xf32>
    %cst_48 = arith.constant 0.000000e+00 : f32
    %142 = vector.broadcast %cst_48 : f32 to vector<32x64xf32>
    %143 = arith.maximumf %141, %142 : vector<32x64xf32>
    %c352 = arith.constant 352 : index
    %c0_49 = arith.constant 0 : index
    %144 = vector.load %arg1[%c352, %c0_49] : memref<672x128xf32, #tpu.memory_space<vmem>>, vector<64x32xf32>
    %cst_50 = arith.constant dense<0.000000e+00> : vector<32x32xf32>
    %145 = tpu.matmul %143, %144, %cst_50 {dimension_numbers = #tpu.dot_dimension_numbers<[1], [0], [0], [1], [0, 0, 1, 1], [], []>} : vector<32x64xf32>, vector<64x32xf32>, vector<32x32xf32> -> vector<32x32xf32>
    %146 = arith.addf %136, %145 : vector<32x32xf32>
    %c38 = arith.constant 38 : index
    %c0_51 = arith.constant 0 : index
    %147 = vector.load %arg2[%c38, %c0_51] : memref<152x128xf32, #tpu.memory_space<vmem>>, vector<1x32xf32>
    %148 = vector.broadcast %147 : vector<1x32xf32> to vector<32x32xf32>
    %149 = arith.addf %146, %148 : vector<32x32xf32>
    %c39 = arith.constant 39 : index
    %c0_52 = arith.constant 0 : index
    %150 = vector.load %arg2[%c39, %c0_52] : memref<152x128xf32, #tpu.memory_space<vmem>>, vector<1x32xf32>
    %c40 = arith.constant 40 : index
    %c0_53 = arith.constant 0 : index
    %151 = vector.load %arg2[%c40, %c0_53] : memref<152x128xf32, #tpu.memory_space<vmem>>, vector<1x32xf32>
    %cst_54 = arith.constant dense<0.000000e+00> : vector<32xf32>
    %152 = vector.multi_reduction <add>, %149, %cst_54 [1] : vector<32x32xf32> to vector<32xf32>
    %153 = vector.shape_cast %152 : vector<32xf32> to vector<32x1xf32>
    %cst_55 = arith.constant 3.200000e+01 : f32
    %154 = vector.broadcast %cst_55 : f32 to vector<32x1xf32>
    %155 = arith.divf %153, %154 : vector<32x1xf32>
    %156 = vector.broadcast %155 : vector<32x1xf32> to vector<32x32xf32>
    %157 = arith.subf %149, %156 : vector<32x32xf32>
    %158 = arith.mulf %157, %157 : vector<32x32xf32>
    %cst_56 = arith.constant dense<0.000000e+00> : vector<32xf32>
    %159 = vector.multi_reduction <add>, %158, %cst_56 [1] : vector<32x32xf32> to vector<32xf32>
    %160 = vector.shape_cast %159 : vector<32xf32> to vector<32x1xf32>
    %cst_57 = arith.constant 3.200000e+01 : f32
    %161 = vector.broadcast %cst_57 : f32 to vector<32x1xf32>
    %162 = arith.divf %160, %161 : vector<32x1xf32>
    %163 = vector.broadcast %155 : vector<32x1xf32> to vector<32x32xf32>
    %164 = arith.subf %149, %163 : vector<32x32xf32>
    %cst_58 = arith.constant 9.99999974E-6 : f32
    %165 = vector.broadcast %cst_58 : f32 to vector<32x1xf32>
    %166 = arith.addf %162, %165 : vector<32x1xf32>
    %167 = math.rsqrt %166 : vector<32x1xf32>
    %168 = vector.broadcast %167 : vector<32x1xf32> to vector<32x32xf32>
    %169 = arith.mulf %164, %168 : vector<32x32xf32>
    %170 = vector.broadcast %150 : vector<1x32xf32> to vector<32x32xf32>
    %171 = arith.mulf %169, %170 : vector<32x32xf32>
    %172 = vector.broadcast %151 : vector<1x32xf32> to vector<32x32xf32>
    %173 = arith.addf %171, %172 : vector<32x32xf32>
    %c73 = arith.constant 73 : index
    %c0_59 = arith.constant 0 : index
    %174 = vector.load %arg2[%c73, %c0_59] : memref<152x128xf32, #tpu.memory_space<vmem>>, vector<8x32xf32>
    %c416 = arith.constant 416 : index
    %c0_60 = arith.constant 0 : index
    %175 = vector.load %arg1[%c416, %c0_60] : memref<672x128xf32, #tpu.memory_space<vmem>>, vector<32x64xf32>
    %cst_61 = arith.constant dense<0.000000e+00> : vector<32x64xf32>
    %176 = tpu.matmul %173, %175, %cst_61 {dimension_numbers = #tpu.dot_dimension_numbers<[1], [0], [0], [1], [0, 0, 1, 1], [], []>} : vector<32x32xf32>, vector<32x64xf32>, vector<32x64xf32> -> vector<32x64xf32>
    %c89 = arith.constant 89 : index
    %c0_62 = arith.constant 0 : index
    %177 = vector.load %arg2[%c89, %c0_62] : memref<152x128xf32, #tpu.memory_space<vmem>>, vector<32x64xf32>
    %178 = arith.addf %176, %177 : vector<32x64xf32>
    %179 = vector.extract_strided_slice %178 {offsets = [0, 0], sizes = [32, 32], strides = [1, 1]} : vector<32x64xf32> to vector<32x32xf32>
    %180 = vector.extract_strided_slice %178 {offsets = [0, 32], sizes = [32, 32], strides = [1, 1]} : vector<32x64xf32> to vector<32x32xf32>
    %c81 = arith.constant 81 : index
    %c0_63 = arith.constant 0 : index
    %181 = vector.load %arg2[%c81, %c0_63] : memref<152x128xf32, #tpu.memory_space<vmem>>, vector<8x32xf32>
    %c128 = arith.constant 128 : index
    %c0_64 = arith.constant 0 : index
    %182 = vector.load %arg2[%c128, %c0_64] : memref<152x128xf32, #tpu.memory_space<vmem>>, vector<8x32xf32>
    %cst_65 = arith.constant 0.000000e+00 : f32
    %183 = vector.broadcast %cst_65 : f32 to vector<8x32xf32>
    %184 = vector.extract_strided_slice %0 {offsets = [0, 0], sizes = [1, 32], strides = [1, 1]} : vector<4x32xf32> to vector<1x32xf32>
    %185 = vector.broadcast %184 : vector<1x32xf32> to vector<8x32xf32>
    %186 = arith.mulf %181, %185 : vector<8x32xf32>
    %cst_66 = arith.constant dense<0.000000e+00> : vector<8x32xf32>
    %187 = tpu.matmul %186, %179, %cst_66 {dimension_numbers = #tpu.dot_dimension_numbers<[1], [1], [0], [0], [0, 0, 1, 0], [], []>} : vector<8x32xf32>, vector<32x32xf32>, vector<8x32xf32> -> vector<8x32xf32>
    %cst_67 = arith.constant 0.353553385 : f32
    %188 = vector.broadcast %cst_67 : f32 to vector<8x32xf32>
    %189 = arith.mulf %187, %188 : vector<8x32xf32>
    %190 = arith.addf %189, %182 : vector<8x32xf32>
    %cst_68 = arith.constant dense<0xFF800000> : vector<8xf32>
    %191 = vector.multi_reduction <maximumf>, %190, %cst_68 [1] : vector<8x32xf32> to vector<8xf32>
    %192 = vector.shape_cast %191 : vector<8xf32> to vector<8x1xf32>
    %193 = vector.broadcast %192 : vector<8x1xf32> to vector<8x32xf32>
    %194 = arith.subf %190, %193 : vector<8x32xf32>
    %195 = math.exp %194 : vector<8x32xf32>
    %cst_69 = arith.constant dense<0.000000e+00> : vector<8xf32>
    %196 = vector.multi_reduction <add>, %195, %cst_69 [1] : vector<8x32xf32> to vector<8xf32>
    %197 = vector.shape_cast %196 : vector<8xf32> to vector<8x1xf32>
    %198 = tpu.reciprocal %197 {approx = true} : vector<8x1xf32> -> vector<8x1xf32>
    %199 = vector.broadcast %198 : vector<8x1xf32> to vector<8x32xf32>
    %200 = arith.mulf %195, %199 : vector<8x32xf32>
    %cst_70 = arith.constant dense<0.000000e+00> : vector<8x32xf32>
    %201 = tpu.matmul %200, %180, %cst_70 {dimension_numbers = #tpu.dot_dimension_numbers<[1], [0], [0], [1], [0, 0, 1, 1], [], []>} : vector<8x32xf32>, vector<32x32xf32>, vector<8x32xf32> -> vector<8x32xf32>
    %202 = vector.broadcast %184 : vector<1x32xf32> to vector<8x32xf32>
    %203 = arith.mulf %202, %201 : vector<8x32xf32>
    %204 = arith.addf %183, %203 : vector<8x32xf32>
    %205 = vector.extract_strided_slice %0 {offsets = [1, 0], sizes = [1, 32], strides = [1, 1]} : vector<4x32xf32> to vector<1x32xf32>
    %206 = vector.broadcast %205 : vector<1x32xf32> to vector<8x32xf32>
    %207 = arith.mulf %181, %206 : vector<8x32xf32>
    %cst_71 = arith.constant dense<0.000000e+00> : vector<8x32xf32>
    %208 = tpu.matmul %207, %179, %cst_71 {dimension_numbers = #tpu.dot_dimension_numbers<[1], [1], [0], [0], [0, 0, 1, 0], [], []>} : vector<8x32xf32>, vector<32x32xf32>, vector<8x32xf32> -> vector<8x32xf32>
    %cst_72 = arith.constant 0.353553385 : f32
    %209 = vector.broadcast %cst_72 : f32 to vector<8x32xf32>
    %210 = arith.mulf %208, %209 : vector<8x32xf32>
    %211 = arith.addf %210, %182 : vector<8x32xf32>
    %cst_73 = arith.constant dense<0xFF800000> : vector<8xf32>
    %212 = vector.multi_reduction <maximumf>, %211, %cst_73 [1] : vector<8x32xf32> to vector<8xf32>
    %213 = vector.shape_cast %212 : vector<8xf32> to vector<8x1xf32>
    %214 = vector.broadcast %213 : vector<8x1xf32> to vector<8x32xf32>
    %215 = arith.subf %211, %214 : vector<8x32xf32>
    %216 = math.exp %215 : vector<8x32xf32>
    %cst_74 = arith.constant dense<0.000000e+00> : vector<8xf32>
    %217 = vector.multi_reduction <add>, %216, %cst_74 [1] : vector<8x32xf32> to vector<8xf32>
    %218 = vector.shape_cast %217 : vector<8xf32> to vector<8x1xf32>
    %219 = tpu.reciprocal %218 {approx = true} : vector<8x1xf32> -> vector<8x1xf32>
    %220 = vector.broadcast %219 : vector<8x1xf32> to vector<8x32xf32>
    %221 = arith.mulf %216, %220 : vector<8x32xf32>
    %cst_75 = arith.constant dense<0.000000e+00> : vector<8x32xf32>
    %222 = tpu.matmul %221, %180, %cst_75 {dimension_numbers = #tpu.dot_dimension_numbers<[1], [0], [0], [1], [0, 0, 1, 1], [], []>} : vector<8x32xf32>, vector<32x32xf32>, vector<8x32xf32> -> vector<8x32xf32>
    %223 = vector.broadcast %205 : vector<1x32xf32> to vector<8x32xf32>
    %224 = arith.mulf %223, %222 : vector<8x32xf32>
    %225 = arith.addf %204, %224 : vector<8x32xf32>
    %226 = vector.extract_strided_slice %0 {offsets = [2, 0], sizes = [1, 32], strides = [1, 1]} : vector<4x32xf32> to vector<1x32xf32>
    %227 = vector.broadcast %226 : vector<1x32xf32> to vector<8x32xf32>
    %228 = arith.mulf %181, %227 : vector<8x32xf32>
    %cst_76 = arith.constant dense<0.000000e+00> : vector<8x32xf32>
    %229 = tpu.matmul %228, %179, %cst_76 {dimension_numbers = #tpu.dot_dimension_numbers<[1], [1], [0], [0], [0, 0, 1, 0], [], []>} : vector<8x32xf32>, vector<32x32xf32>, vector<8x32xf32> -> vector<8x32xf32>
    %cst_77 = arith.constant 0.353553385 : f32
    %230 = vector.broadcast %cst_77 : f32 to vector<8x32xf32>
    %231 = arith.mulf %229, %230 : vector<8x32xf32>
    %232 = arith.addf %231, %182 : vector<8x32xf32>
    %cst_78 = arith.constant dense<0xFF800000> : vector<8xf32>
    %233 = vector.multi_reduction <maximumf>, %232, %cst_78 [1] : vector<8x32xf32> to vector<8xf32>
    %234 = vector.shape_cast %233 : vector<8xf32> to vector<8x1xf32>
    %235 = vector.broadcast %234 : vector<8x1xf32> to vector<8x32xf32>
    %236 = arith.subf %232, %235 : vector<8x32xf32>
    %237 = math.exp %236 : vector<8x32xf32>
    %cst_79 = arith.constant dense<0.000000e+00> : vector<8xf32>
    %238 = vector.multi_reduction <add>, %237, %cst_79 [1] : vector<8x32xf32> to vector<8xf32>
    %239 = vector.shape_cast %238 : vector<8xf32> to vector<8x1xf32>
    %240 = tpu.reciprocal %239 {approx = true} : vector<8x1xf32> -> vector<8x1xf32>
    %241 = vector.broadcast %240 : vector<8x1xf32> to vector<8x32xf32>
    %242 = arith.mulf %237, %241 : vector<8x32xf32>
    %cst_80 = arith.constant dense<0.000000e+00> : vector<8x32xf32>
    %243 = tpu.matmul %242, %180, %cst_80 {dimension_numbers = #tpu.dot_dimension_numbers<[1], [0], [0], [1], [0, 0, 1, 1], [], []>} : vector<8x32xf32>, vector<32x32xf32>, vector<8x32xf32> -> vector<8x32xf32>
    %244 = vector.broadcast %226 : vector<1x32xf32> to vector<8x32xf32>
    %245 = arith.mulf %244, %243 : vector<8x32xf32>
    %246 = arith.addf %225, %245 : vector<8x32xf32>
    %247 = vector.extract_strided_slice %0 {offsets = [3, 0], sizes = [1, 32], strides = [1, 1]} : vector<4x32xf32> to vector<1x32xf32>
    %248 = vector.broadcast %247 : vector<1x32xf32> to vector<8x32xf32>
    %249 = arith.mulf %181, %248 : vector<8x32xf32>
    %cst_81 = arith.constant dense<0.000000e+00> : vector<8x32xf32>
    %250 = tpu.matmul %249, %179, %cst_81 {dimension_numbers = #tpu.dot_dimension_numbers<[1], [1], [0], [0], [0, 0, 1, 0], [], []>} : vector<8x32xf32>, vector<32x32xf32>, vector<8x32xf32> -> vector<8x32xf32>
    %cst_82 = arith.constant 0.353553385 : f32
    %251 = vector.broadcast %cst_82 : f32 to vector<8x32xf32>
    %252 = arith.mulf %250, %251 : vector<8x32xf32>
    %253 = arith.addf %252, %182 : vector<8x32xf32>
    %cst_83 = arith.constant dense<0xFF800000> : vector<8xf32>
    %254 = vector.multi_reduction <maximumf>, %253, %cst_83 [1] : vector<8x32xf32> to vector<8xf32>
    %255 = vector.shape_cast %254 : vector<8xf32> to vector<8x1xf32>
    %256 = vector.broadcast %255 : vector<8x1xf32> to vector<8x32xf32>
    %257 = arith.subf %253, %256 : vector<8x32xf32>
    %258 = math.exp %257 : vector<8x32xf32>
    %cst_84 = arith.constant dense<0.000000e+00> : vector<8xf32>
    %259 = vector.multi_reduction <add>, %258, %cst_84 [1] : vector<8x32xf32> to vector<8xf32>
    %260 = vector.shape_cast %259 : vector<8xf32> to vector<8x1xf32>
    %261 = tpu.reciprocal %260 {approx = true} : vector<8x1xf32> -> vector<8x1xf32>
    %262 = vector.broadcast %261 : vector<8x1xf32> to vector<8x32xf32>
    %263 = arith.mulf %258, %262 : vector<8x32xf32>
    %cst_85 = arith.constant dense<0.000000e+00> : vector<8x32xf32>
    %264 = tpu.matmul %263, %180, %cst_85 {dimension_numbers = #tpu.dot_dimension_numbers<[1], [0], [0], [1], [0, 0, 1, 1], [], []>} : vector<8x32xf32>, vector<32x32xf32>, vector<8x32xf32> -> vector<8x32xf32>
    %265 = vector.broadcast %247 : vector<1x32xf32> to vector<8x32xf32>
    %266 = arith.mulf %265, %264 : vector<8x32xf32>
    %267 = arith.addf %246, %266 : vector<8x32xf32>
    %c448 = arith.constant 448 : index
    %c0_86 = arith.constant 0 : index
    %268 = vector.load %arg1[%c448, %c0_86] : memref<672x128xf32, #tpu.memory_space<vmem>>, vector<32x32xf32>
    %cst_87 = arith.constant dense<0.000000e+00> : vector<8x32xf32>
    %269 = tpu.matmul %267, %268, %cst_87 {dimension_numbers = #tpu.dot_dimension_numbers<[1], [0], [0], [1], [0, 0, 1, 1], [], []>} : vector<8x32xf32>, vector<32x32xf32>, vector<8x32xf32> -> vector<8x32xf32>
    %270 = arith.addf %174, %269 : vector<8x32xf32>
    %c121 = arith.constant 121 : index
    %c0_88 = arith.constant 0 : index
    %271 = vector.load %arg2[%c121, %c0_88] : memref<152x128xf32, #tpu.memory_space<vmem>>, vector<1x32xf32>
    %272 = vector.broadcast %271 : vector<1x32xf32> to vector<8x32xf32>
    %273 = arith.addf %270, %272 : vector<8x32xf32>
    %c122 = arith.constant 122 : index
    %c0_89 = arith.constant 0 : index
    %274 = vector.load %arg2[%c122, %c0_89] : memref<152x128xf32, #tpu.memory_space<vmem>>, vector<1x32xf32>
    %c123 = arith.constant 123 : index
    %c0_90 = arith.constant 0 : index
    %275 = vector.load %arg2[%c123, %c0_90] : memref<152x128xf32, #tpu.memory_space<vmem>>, vector<1x32xf32>
    %cst_91 = arith.constant dense<0.000000e+00> : vector<8xf32>
    %276 = vector.multi_reduction <add>, %273, %cst_91 [1] : vector<8x32xf32> to vector<8xf32>
    %277 = vector.shape_cast %276 : vector<8xf32> to vector<8x1xf32>
    %cst_92 = arith.constant 3.200000e+01 : f32
    %278 = vector.broadcast %cst_92 : f32 to vector<8x1xf32>
    %279 = arith.divf %277, %278 : vector<8x1xf32>
    %280 = vector.broadcast %279 : vector<8x1xf32> to vector<8x32xf32>
    %281 = arith.subf %273, %280 : vector<8x32xf32>
    %282 = arith.mulf %281, %281 : vector<8x32xf32>
    %cst_93 = arith.constant dense<0.000000e+00> : vector<8xf32>
    %283 = vector.multi_reduction <add>, %282, %cst_93 [1] : vector<8x32xf32> to vector<8xf32>
    %284 = vector.shape_cast %283 : vector<8xf32> to vector<8x1xf32>
    %cst_94 = arith.constant 3.200000e+01 : f32
    %285 = vector.broadcast %cst_94 : f32 to vector<8x1xf32>
    %286 = arith.divf %284, %285 : vector<8x1xf32>
    %287 = vector.broadcast %279 : vector<8x1xf32> to vector<8x32xf32>
    %288 = arith.subf %273, %287 : vector<8x32xf32>
    %cst_95 = arith.constant 9.99999974E-6 : f32
    %289 = vector.broadcast %cst_95 : f32 to vector<8x1xf32>
    %290 = arith.addf %286, %289 : vector<8x1xf32>
    %291 = math.rsqrt %290 : vector<8x1xf32>
    %292 = vector.broadcast %291 : vector<8x1xf32> to vector<8x32xf32>
    %293 = arith.mulf %288, %292 : vector<8x32xf32>
    %294 = vector.broadcast %274 : vector<1x32xf32> to vector<8x32xf32>
    %295 = arith.mulf %293, %294 : vector<8x32xf32>
    %296 = vector.broadcast %275 : vector<1x32xf32> to vector<8x32xf32>
    %297 = arith.addf %295, %296 : vector<8x32xf32>
    %c480 = arith.constant 480 : index
    %c0_96 = arith.constant 0 : index
    %298 = vector.load %arg1[%c480, %c0_96] : memref<672x128xf32, #tpu.memory_space<vmem>>, vector<32x64xf32>
    %cst_97 = arith.constant dense<0.000000e+00> : vector<8x64xf32>
    %299 = tpu.matmul %297, %298, %cst_97 {dimension_numbers = #tpu.dot_dimension_numbers<[1], [0], [0], [1], [0, 0, 1, 1], [], []>} : vector<8x32xf32>, vector<32x64xf32>, vector<8x64xf32> -> vector<8x64xf32>
    %c124 = arith.constant 124 : index
    %c0_98 = arith.constant 0 : index
    %300 = vector.load %arg2[%c124, %c0_98] : memref<152x128xf32, #tpu.memory_space<vmem>>, vector<1x64xf32>
    %301 = vector.broadcast %300 : vector<1x64xf32> to vector<8x64xf32>
    %302 = arith.addf %299, %301 : vector<8x64xf32>
    %cst_99 = arith.constant 0.000000e+00 : f32
    %303 = vector.broadcast %cst_99 : f32 to vector<8x64xf32>
    %304 = arith.maximumf %302, %303 : vector<8x64xf32>
    %c512 = arith.constant 512 : index
    %c0_100 = arith.constant 0 : index
    %305 = vector.load %arg1[%c512, %c0_100] : memref<672x128xf32, #tpu.memory_space<vmem>>, vector<64x32xf32>
    %cst_101 = arith.constant dense<0.000000e+00> : vector<8x32xf32>
    %306 = tpu.matmul %304, %305, %cst_101 {dimension_numbers = #tpu.dot_dimension_numbers<[1], [0], [0], [1], [0, 0, 1, 1], [], []>} : vector<8x64xf32>, vector<64x32xf32>, vector<8x32xf32> -> vector<8x32xf32>
    %307 = arith.addf %297, %306 : vector<8x32xf32>
    %c125 = arith.constant 125 : index
    %c0_102 = arith.constant 0 : index
    %308 = vector.load %arg2[%c125, %c0_102] : memref<152x128xf32, #tpu.memory_space<vmem>>, vector<1x32xf32>
    %309 = vector.broadcast %308 : vector<1x32xf32> to vector<8x32xf32>
    %310 = arith.addf %307, %309 : vector<8x32xf32>
    %c126 = arith.constant 126 : index
    %c0_103 = arith.constant 0 : index
    %311 = vector.load %arg2[%c126, %c0_103] : memref<152x128xf32, #tpu.memory_space<vmem>>, vector<1x32xf32>
    %c127 = arith.constant 127 : index
    %c0_104 = arith.constant 0 : index
    %312 = vector.load %arg2[%c127, %c0_104] : memref<152x128xf32, #tpu.memory_space<vmem>>, vector<1x32xf32>
    %cst_105 = arith.constant dense<0.000000e+00> : vector<8xf32>
    %313 = vector.multi_reduction <add>, %310, %cst_105 [1] : vector<8x32xf32> to vector<8xf32>
    %314 = vector.shape_cast %313 : vector<8xf32> to vector<8x1xf32>
    %cst_106 = arith.constant 3.200000e+01 : f32
    %315 = vector.broadcast %cst_106 : f32 to vector<8x1xf32>
    %316 = arith.divf %314, %315 : vector<8x1xf32>
    %317 = vector.broadcast %316 : vector<8x1xf32> to vector<8x32xf32>
    %318 = arith.subf %310, %317 : vector<8x32xf32>
    %319 = arith.mulf %318, %318 : vector<8x32xf32>
    %cst_107 = arith.constant dense<0.000000e+00> : vector<8xf32>
    %320 = vector.multi_reduction <add>, %319, %cst_107 [1] : vector<8x32xf32> to vector<8xf32>
    %321 = vector.shape_cast %320 : vector<8xf32> to vector<8x1xf32>
    %cst_108 = arith.constant 3.200000e+01 : f32
    %322 = vector.broadcast %cst_108 : f32 to vector<8x1xf32>
    %323 = arith.divf %321, %322 : vector<8x1xf32>
    %324 = vector.broadcast %316 : vector<8x1xf32> to vector<8x32xf32>
    %325 = arith.subf %310, %324 : vector<8x32xf32>
    %cst_109 = arith.constant 9.99999974E-6 : f32
    %326 = vector.broadcast %cst_109 : f32 to vector<8x1xf32>
    %327 = arith.addf %323, %326 : vector<8x1xf32>
    %328 = math.rsqrt %327 : vector<8x1xf32>
    %329 = vector.broadcast %328 : vector<8x1xf32> to vector<8x32xf32>
    %330 = arith.mulf %325, %329 : vector<8x32xf32>
    %331 = vector.broadcast %311 : vector<1x32xf32> to vector<8x32xf32>
    %332 = arith.mulf %330, %331 : vector<8x32xf32>
    %333 = vector.broadcast %312 : vector<1x32xf32> to vector<8x32xf32>
    %334 = arith.addf %332, %333 : vector<8x32xf32>
    %c136 = arith.constant 136 : index
    %c0_110 = arith.constant 0 : index
    %335 = vector.load %arg2[%c136, %c0_110] : memref<152x128xf32, #tpu.memory_space<vmem>>, vector<1x32xf32>
    %c137 = arith.constant 137 : index
    %c0_111 = arith.constant 0 : index
    %336 = vector.load %arg2[%c137, %c0_111] : memref<152x128xf32, #tpu.memory_space<vmem>>, vector<1x32xf32>
    %cst_112 = arith.constant dense<0.000000e+00> : vector<8xf32>
    %337 = vector.multi_reduction <add>, %334, %cst_112 [1] : vector<8x32xf32> to vector<8xf32>
    %338 = vector.shape_cast %337 : vector<8xf32> to vector<8x1xf32>
    %cst_113 = arith.constant 3.200000e+01 : f32
    %339 = vector.broadcast %cst_113 : f32 to vector<8x1xf32>
    %340 = arith.divf %338, %339 : vector<8x1xf32>
    %341 = vector.broadcast %340 : vector<8x1xf32> to vector<8x32xf32>
    %342 = arith.subf %334, %341 : vector<8x32xf32>
    %343 = arith.mulf %342, %342 : vector<8x32xf32>
    %cst_114 = arith.constant dense<0.000000e+00> : vector<8xf32>
    %344 = vector.multi_reduction <add>, %343, %cst_114 [1] : vector<8x32xf32> to vector<8xf32>
    %345 = vector.shape_cast %344 : vector<8xf32> to vector<8x1xf32>
    %cst_115 = arith.constant 3.200000e+01 : f32
    %346 = vector.broadcast %cst_115 : f32 to vector<8x1xf32>
    %347 = arith.divf %345, %346 : vector<8x1xf32>
    %348 = vector.broadcast %340 : vector<8x1xf32> to vector<8x32xf32>
    %349 = arith.subf %334, %348 : vector<8x32xf32>
    %cst_116 = arith.constant 9.99999974E-6 : f32
    %350 = vector.broadcast %cst_116 : f32 to vector<8x1xf32>
    %351 = arith.addf %347, %350 : vector<8x1xf32>
    %352 = math.rsqrt %351 : vector<8x1xf32>
    %353 = vector.broadcast %352 : vector<8x1xf32> to vector<8x32xf32>
    %354 = arith.mulf %349, %353 : vector<8x32xf32>
    %355 = vector.broadcast %335 : vector<1x32xf32> to vector<8x32xf32>
    %356 = arith.mulf %354, %355 : vector<8x32xf32>
    %357 = vector.broadcast %336 : vector<1x32xf32> to vector<8x32xf32>
    %358 = arith.addf %356, %357 : vector<8x32xf32>
    %c576 = arith.constant 576 : index
    %c0_117 = arith.constant 0 : index
    %359 = vector.load %arg1[%c576, %c0_117] : memref<672x128xf32, #tpu.memory_space<vmem>>, vector<32x48xf32>
    %cst_118 = arith.constant dense<0.000000e+00> : vector<8x48xf32>
    %360 = tpu.matmul %358, %359, %cst_118 {dimension_numbers = #tpu.dot_dimension_numbers<[1], [0], [0], [1], [0, 0, 1, 1], [], []>} : vector<8x32xf32>, vector<32x48xf32>, vector<8x48xf32> -> vector<8x48xf32>
    %c138 = arith.constant 138 : index
    %c0_119 = arith.constant 0 : index
    %361 = vector.load %arg2[%c138, %c0_119] : memref<152x128xf32, #tpu.memory_space<vmem>>, vector<1x48xf32>
    %362 = vector.broadcast %361 : vector<1x48xf32> to vector<8x48xf32>
    %363 = arith.addf %360, %362 : vector<8x48xf32>
    %364 = vector.extract_strided_slice %363 {offsets = [0, 0], sizes = [8, 16], strides = [1, 1]} : vector<8x48xf32> to vector<8x16xf32>
    %365 = vector.extract_strided_slice %363 {offsets = [0, 16], sizes = [8, 32], strides = [1, 1]} : vector<8x48xf32> to vector<8x32xf32>
    %cst_120 = arith.constant 0.000000e+00 : f32
    %366 = vector.broadcast %cst_120 : f32 to vector<8x32xf32>
    %367 = arith.maximumf %365, %366 : vector<8x32xf32>
    %c608 = arith.constant 608 : index
    %c0_121 = arith.constant 0 : index
    %368 = vector.load %arg1[%c608, %c0_121] : memref<672x128xf32, #tpu.memory_space<vmem>>, vector<32x32xf32>
    %cst_122 = arith.constant dense<0.000000e+00> : vector<8x32xf32>
    %369 = tpu.matmul %367, %368, %cst_122 {dimension_numbers = #tpu.dot_dimension_numbers<[1], [0], [0], [1], [0, 0, 1, 1], [], []>} : vector<8x32xf32>, vector<32x32xf32>, vector<8x32xf32> -> vector<8x32xf32>
    %c139 = arith.constant 139 : index
    %c0_123 = arith.constant 0 : index
    %370 = vector.load %arg2[%c139, %c0_123] : memref<152x128xf32, #tpu.memory_space<vmem>>, vector<1x32xf32>
    %371 = vector.broadcast %370 : vector<1x32xf32> to vector<8x32xf32>
    %372 = arith.addf %369, %371 : vector<8x32xf32>
    %cst_124 = arith.constant 0.000000e+00 : f32
    %373 = vector.broadcast %cst_124 : f32 to vector<8x32xf32>
    %374 = arith.maximumf %372, %373 : vector<8x32xf32>
    %c640 = arith.constant 640 : index
    %c0_125 = arith.constant 0 : index
    %375 = vector.load %arg1[%c640, %c0_125] : memref<672x128xf32, #tpu.memory_space<vmem>>, vector<32x4xf32>
    %cst_126 = arith.constant dense<0.000000e+00> : vector<8x4xf32>
    %376 = tpu.matmul %374, %375, %cst_126 {dimension_numbers = #tpu.dot_dimension_numbers<[1], [0], [0], [1], [0, 0, 1, 1], [], []>} : vector<8x32xf32>, vector<32x4xf32>, vector<8x4xf32> -> vector<8x4xf32>
    %c140 = arith.constant 140 : index
    %c0_127 = arith.constant 0 : index
    %377 = vector.load %arg2[%c140, %c0_127] : memref<152x128xf32, #tpu.memory_space<vmem>>, vector<1x4xf32>
    %378 = vector.broadcast %377 : vector<1x4xf32> to vector<8x4xf32>
    %379 = arith.addf %376, %378 : vector<8x4xf32>
    %380 = arith.negf %379 : vector<8x4xf32>
    %381 = math.exp %380 : vector<8x4xf32>
    %cst_128 = arith.constant 1.000000e+00 : f32
    %382 = vector.broadcast %cst_128 : f32 to vector<8x4xf32>
    %383 = arith.addf %382, %381 : vector<8x4xf32>
    %384 = arith.divf %382, %383 : vector<8x4xf32>
    %cst_129 = arith.constant 0.000000e+00 : f32
    %385 = vector.broadcast %cst_129 : f32 to vector<8x108xf32>
    %386 = tpu.concatenate %364, %384, %385 in 1 : vector<8x16xf32>, vector<8x4xf32>, vector<8x108xf32> -> vector<8x128xf32>
    %c0_130 = arith.constant 0 : index
    %c0_131 = arith.constant 0 : index
    %387 = vector.load %arg3[%c0_130, %c0_131] : memref<8x128xf32, #tpu.memory_space<vmem>>, vector<8x128xf32>
    tpu.vector_store %arg3[%c0_130, %c0_131], %386 {strides = array<i32>} : memref<8x128xf32, #tpu.memory_space<vmem>>, vector<8x128xf32>,
    return
  }
}

</mosaic_0001>

<bundles_post_ra>
// kernel: fwd.1
= control target key start
LH: loop header
LB: loop body
LE: loop exit
PB: predicated region body
PF: predicated region fallthrough
CT: control target
= control target key end

     0   :  { %v4433_v0 = vmov 0.0|0.0   ;;  %vm52_vm0 = vcmask 523264   ;;  %vm272_vm1 = vcmask 261120   ;;  %s4434_s28 = smov 96   ;;  %s4435_s13 = smov 64   ;;  %vm4436_vm3 = vmmov 0   ;;  %s5354_s1 = inlined_call_operand.vmem [shape: f32[672,128], index: 1, kind: input, shape index: {}]   ;;  %s5355_s0 = inlined_call_operand.vmem [shape: f32[32,192], index: 0, kind: input, shape index: {}]   ;;  %s5356_s2 = inlined_call_operand.vmem [shape: f32[152,128], index: 2, kind: input, shape index: {}]   ;;  %s5357_s3 = inlined_call_operand.vmem [shape: f32[8,128], index: 3, kind: output, shape index: {}]  }
   0x1   :  { %4012 = vmatprep.subr.bf16.mxu0 %v4433_v0  ;;  %v23_v1 = vld [vmem:[%s5354_s1] sm:$0xff]  ;;  %v24_v2 = vld [vmem:[%s5354_s1 + $0x8] sm:$0xff]  ;;  %v25_v3 = vld [vmem:[%s5354_s1 + $0x10] sm:$0xff]  ;;  %s4438_s16 = smov 112   ;;  %vm3307_vm4 = vcmask 130048   ;;  %vm3309_vm5 = vcmask 162816  }
   0x2   :  { %v4013_v4 = vpack.c.bf16 %v24_v2, %v23_v1  ;;  %v26_v5 = vld [vmem:[%s5354_s1 + $0x18] sm:$0xff]  ;;  %v27_v7 = vld [vmem:[%s5354_s1 + $0x20] sm:$0xff]  ;;  %v28_v8 = vld [vmem:[%s5354_s1 + $0x28] sm:$0xff] }
   0x3   :  { %v4016_v6 = vpack.c.bf16 %v26_v5, %v25_v3  ;;  %v4019_v9 = vpack.c.bf16 %v28_v8, %v27_v7  ;;  %v29_v10 = vld [vmem:[%s5354_s1 + $0x30] sm:$0xff]  ;;  %v30_v11 = vld [vmem:[%s5354_s1 + $0x38] sm:$0xff]  ;;  %v16_v12 = vld [vmem:[%s5355_s0 + $0x8] sm:$0xff] }
   0x4   :  { %4014 = vmatpush1.bf16.msra.mxu0 %v4013_v4  ;;  %3317 = vmatprep.mubr.msk.f32.mxu0 %vm52_vm0, %v16_v12  ;;  %v154_v13 = vld [vmem:[%s5354_s1 + $0xc0] sm:$0xff]  ;;  %v4022_v14 = vpack.c.bf16 %v30_v11, %v29_v10  ;;  %v155_v15 = vld [vmem:[%s5354_s1 + $0xc8] sm:$0xff]  ;;  %v156_v16 = vld [vmem:[%s5354_s1 + $0xd0] sm:$0xff] }
   0x5   :  { %4015 = vmatprep.subr.bf16.mxu0 %v4433_v0  ;;  %v157_v17 = vld [vmem:[%s5354_s1 + $0xd8] sm:$0xff]  ;;  %v31_v18 = vld [vmem:[%s5354_s1 + $0x40] sm:$0xff]  ;;  %v32_v19 = vld [vmem:[%s5354_s1 + $0x48] sm:$0xff]  ;;  %v4048_v20 = vpack.c.bf16 %v155_v15, %v154_v13 }
   0x6   :  { %v4052_v21 = vpack.c.bf16 %v157_v17, %v156_v16  ;;  %v4025_v22 = vpack.c.bf16 %v32_v19, %v31_v18  ;;  %v33_v23 = vld [vmem:[%s5354_s1 + $0x50] sm:$0xff]  ;;  %v34_v24 = vld [vmem:[%s5354_s1 + $0x58] sm:$0xff]  ;;  %v35_v26 = vld [vmem:[%s5354_s1 + $0x60] sm:$0xff] }
   0x7   :  { %4049 = vmatprep.subr.bf16.mxu1 %v4048_v20  ;;  %v4028_v25 = vpack.c.bf16 %v34_v24, %v33_v23  ;;  %v36_v27 = vld [vmem:[%s5354_s1 + $0x68] sm:$0xff]  ;;  %v37_v29 = vld [vmem:[%s5354_s1 + $0x70] sm:$0xff]  ;;  %v38_v30 = vld [vmem:[%s5354_s1 + $0x78] sm:$0xff] }
   0x8   :  { %4017 = vmatpush1.bf16.msra.mxu0 %v4016_v6  ;;  %4051 = vmatpush3.bf16.msra.mxu1 %v4048_v20  ;;  %v4031_v28 = vpack.c.bf16 %v36_v27, %v35_v26  ;;  %v4034_v31 = vpack.c.bf16 %v38_v30, %v37_v29  ;;  %v39_v32 = vld [vmem:[%s5354_s1 + $0x80] sm:$0xff]  ;;  %v40_v33 = vld [vmem:[%s5354_s1 + $0x88] sm:$0xff]  ;;  %v41_v35 = vld [vmem:[%s5354_s1 + $0x90] sm:$0xff]  ;;  %v374_v26 = vlaneseq }
   0x9   :  { %4018 = vmatprep.subr.bf16.mxu0 %v4433_v0  ;;  %4053 = vmatprep.subr.bf16.mxu1 %v4052_v21  ;;  %v4037_v34 = vpack.c.bf16 %v40_v33, %v39_v32  ;;  %v42_v36 = vld [vmem:[%s5354_s1 + $0x98] sm:$0xff]  ;;  %v43_v38 = vld [vmem:[%s5354_s1 + $0xa0] sm:$0xff]  ;;  %v44_v39 = vld [vmem:[%s5354_s1 + $0xa8] sm:$0xff] }
   0xa   :  { %v4040_v37 = vpack.c.bf16 %v42_v36, %v41_v35  ;;  %v4043_v40 = vpack.c.bf16 %v44_v39, %v43_v38  ;;  %v45_v41 = vld [vmem:[%s5354_s1 + $0xb0] sm:$0xff]  ;;  %v46_v42 = vld [vmem:[%s5354_s1 + $0xb8] sm:$0xff]  ;;  %v15_v44 = vld [vmem:[%s5355_s0] sm:$0xff]  ;;  %v375_v27 = vshrl.u32 %v374_v26, 7 }
   0xb   :  { %v4046_v43 = vpack.c.bf16 %v46_v42, %v45_v41  ;;  %v18_v45 = vld [vmem:[%s5355_s0 + $0x18] sm:$0xff]  ;;  %v17_v46 = vld [vmem:[%s5355_s0 + $0x10] sm:$0xff]  ;;  %v20_v47 = vld [vmem:[%s5355_s0 + $0x28] sm:$0xff] }
   0xc   :  { %4020 = vmatpush1.bf16.msra.mxu0 %v4019_v9  ;;  %4055 = vmatpush3.bf16.msra.mxu1 %v4052_v21  ;;  %v19_v48 = vld [vmem:[%s5355_s0 + $0x20] sm:$0xff]  ;;  %v22_v49 = vld [vmem:[%s5355_s0 + $0x38] sm:$0xff]  ;;  %v21_v50 = vld [vmem:[%s5355_s0 + $0x30] sm:$0xff]  ;;  %v932_v29 = vsub.s32 2, %v375_v27  ;;  %v1194_v30 = vsub.s32 3, %v375_v27  ;;  %v376_v33 = vsub.s32 0, %v375_v27 }
   0xd   :  { %4021 = vmatprep.subr.bf16.mxu0 %v4433_v0  ;;  %v158_v51 = vld [vmem:[%s5354_s1 + $0xe0] sm:$0xff]  ;;  %v159_v52 = vld [vmem:[%s5354_s1 + $0xe8] sm:$0xff]  ;;  %v160_v54 = vld [vmem:[%s5354_s1 + $0xf0] sm:$0xff] }
   0xe   :  { %v4056_v53 = vpack.c.bf16 %v159_v52, %v158_v51  ;;  %v161_v55 = vld [vmem:[%s5354_s1 + $0xf8] sm:$0xff]  ;;  %v264_v57 = vld [vmem:[%s5354_s1 + $0x100] sm:$0xff]  ;;  %v265_v58 = vld [vmem:[%s5354_s1 + $0x108] sm:$0xff] }
   0xf   :  { %v4060_v56 = vpack.c.bf16 %v161_v55, %v160_v54  ;;  %v4064_v59 = vpack.c.bf16 %v265_v58, %v264_v57  ;;  %v3316_v60 = vld [vmem:[%s5356_s2] ss:$0 sm:$0xff]  ;;  %v267_v15 = vld [vmem:[%s5354_s1 + $0x118] sm:$0xff]  ;;  %v3321_v17 = vld [vmem:[%s5356_s2 + $0x1] ss:$0 sm:$0xff] }
  0x10   :  { %4023 = vmatpush1.bf16.msra.mxu0 %v4022_v14  ;;  %4057 = vmatprep.subr.bf16.mxu1 %v4056_v53  ;;  %v266_v14 = vld [vmem:[%s5354_s1 + $0x110] sm:$0xff]  ;;  %v268_v36 = vld [vmem:[%s5356_s2 + $0x2] sm:$0xff]  ;;  %vm4685_vm2 = vmpackc.low %vm272_vm1, %vm272_vm1 }
  0x11   :  { %4024 = vmatprep.subr.bf16.mxu0 %v4433_v0  ;;  %4059 = vmatpush3.bf16.msra.mxu1 %v4056_v53  ;;  %v4068_v16 = vpack.c.bf16 %v267_v15, %v266_v14  ;;  %v269_v35 = vld [vmem:[%s5356_s2 + $0xa] sm:$0xff] }
  0x12   :  { %4061 = vmatprep.subr.bf16.mxu1 %v4060_v56 }
  0x14   :  { %4026 = vmatpush1.bf16.msra.mxu0 %v4025_v22 }
  0x15   :  { %4027 = vmatprep.subr.bf16.mxu0 %v4433_v0  ;;  %4063 = vmatpush3.bf16.msra.mxu1 %v4060_v56 }
  0x16   :  { %4065 = vmatprep.subr.bf16.mxu1 %v4064_v59 }
  0x18   :  { %4029 = vmatpush1.bf16.msra.mxu0 %v4028_v25 }
  0x19   :  { %4030 = vmatprep.subr.bf16.mxu0 %v4433_v0 }
  0x1c   :  { %4032 = vmatpush1.bf16.msra.mxu0 %v4031_v28  ;;  %v14_v28 = vld [vmem:[%s5356_s2 + $0x8d] sm:$0xf] }
  0x1d   :  { %4033 = vmatprep.subr.bf16.mxu0 %v4433_v0  ;;  %v4639_v32 = vrot.slane %v14_v28, %v1194_v30  ;;  %v4647_v38 = vrot.slane %v14_v28, %v376_v33 }
  0x20   :  { %4035 = vmatpush1.bf16.msra.mxu0 %v4034_v31  ;;  %v4637_v31 = vrot.slane %v14_v28, %v932_v29 }
  0x21   :  { %4036 = vmatprep.subr.bf16.mxu0 %v4433_v0 }
  0x24   :  { %4038 = vmatpush1.bf16.msra.mxu0 %v4037_v34  ;;  %v670_v34 = vsub.s32 1, %v375_v27  ;;  %v4756_v27 = vld [vmem:[%s5356_s2 + $0x41] sm:$0xff] }
  0x25   :  { %4039 = vmatprep.subr.bf16.mxu0 %v4433_v0 }
  0x26   :  { %v4649_v39 = vrot.slane %v14_v28, %v670_v34 }
  0x28   :  { %4041 = vmatpush1.bf16.msra.mxu0 %v4040_v37 }
  0x29   :  { %4042 = vmatprep.subr.bf16.mxu0 %v4433_v0 }
  0x2c   :  { %4044 = vmatpush1.bf16.msra.mxu0 %v4043_v40 }
  0x2d   :  { %4045 = vmatprep.subr.bf16.mxu0 %v4433_v0 }
  0x30   :  { %4047 = vmatpush1.bf16.msra.mxu0 %v4046_v43 }
  0x33   :  { %130 = vmatmul.mubr.f32.vlgmr.msra.gmra.mrb[0].mxu0 %v15_v44 }
  0x34   :  { %3318 = vmatprep.mubr.msk.f32.mxu0 %vm52_vm0, %v18_v45 }
  0x37   :  { %135 = vmatmul.mubr.f32.gmra.mrb[2].mxu0 %v17_v46  ;;  %v271_v46 = vld [vmem:[%s5356_s2 + $0x1a] sm:$0xff] }
  0x38   :  { %3319 = vmatprep.mubr.msk.f32.mxu0 %vm52_vm0, %v20_v47  ;;  %v270_v47 = vld [vmem:[%s5356_s2 + $0x12] sm:$0xff] }
  0x3b   :  { %140 = vmatmul.mubr.f32.gmra.mrb[4].mxu0 %v19_v48 }
  0x3c   :  { %3320 = vmatprep.mubr.msk.f32.mxu0 %vm52_vm0, %v22_v49 }
  0x3f   :  { %145 = vmatmul.mubr.f32.gmra.mrb[6].mxu0 %v21_v50 }
 0x106   :  { %v131_v61 = vpop.f32.mrb[0].mxu0 }
 0x107   :  { %v132_v62 = vadd.f32 %v3316_v60, %v131_v61  ;;  %v133_v63 = vpop.f32.mrb[1].mxu0 }
 0x109   :  { %v150_v1 = vmax.f32 %v132_v62, 0.0 }
 0x10a   :  { %v136_v2 = vpop.f32.mrb[2].mxu0 }
 0x10b   :  { %v137_v3 = vadd.f32 %v3316_v60, %v136_v2  ;;  %v138_v4 = vpop.f32.mrb[3].mxu0  ;;  %3654 = vmatprep.mubr.msk.f32.mxu1 %vm52_vm0, %v150_v1 }
 0x10d   :  { %v151_v5 = vmax.f32 %v137_v3, 0.0 }
 0x10e   :  { %v141_v6 = vpop.f32.mrb[4].mxu0 }
 0x10f   :  { %v142_v7 = vadd.f32 %v3316_v60, %v141_v6  ;;  %v143_v8 = vpop.f32.mrb[5].mxu0  ;;  %3655 = vmatmul.mubr.msk.f32.vlgmr.msra.gmra.mrb[0].mxu1 %vm52_vm0, %v151_v5 }
 0x110   :  { %4067 = vmatpush3.bf16.msra.mxu1 %v4064_v59 }
 0x111   :  { %v152_v9 = vmax.f32 %v142_v7, 0.0  ;;  %4069 = vmatprep.subr.bf16.mxu1 %v4068_v16 }
 0x112   :  { %v146_v10 = vpop.f32.mrb[6].mxu0 }
 0x113   :  { %v147_v11 = vadd.f32 %v3316_v60, %v146_v10  ;;  %v148_v12 = vpop.f32.mrb[7].mxu0  ;;  %3657 = vmatprep.mubr.msk.f32.mxu1 %vm52_vm0, %v152_v9  ;;  %v4738_v9 = vld [vmem:[%s5356_s2 + $0x29] sm:$0xff] }
 0x114   :  { %4071 = vmatpush3.bf16.msra.mxu1 %v4068_v16  ;;  %v4743_v12 = vld [vmem:[%s5356_s2 + $0x31] sm:$0xff] }
 0x115   :  { %v153_v13 = vmax.f32 %v147_v11, 0.0 }
 0x117   :  { %3658 = vmatmul.mubr.msk.f32.gmra.mrb[2].mxu1 %vm52_vm0, %v153_v13 }
 0x1e2   :  { %v3656_v18 = vpop.f32.mrb[0].mxu1 }
 0x1e3   :  { %v245_v19 = vpop.f32.mrb[1].mxu1  ;;  %v4620_v21 = vadd.f32 %v3656_v18, %v3321_v17  ;;  %v4749_v18 = vld [vmem:[%s5356_s2 + $0x39] sm:$0xff] }
 0x1e4   :  { %v4618_v20 = vadd.f32 %v3321_v17, %v245_v19 }
 0x1e6   :  { %3668 = vmatprep.mubr.msk.f32.mxu1 %vm272_vm1, %v4618_v20 }
 0x1e7   :  { %3669 = vmatmul.mubr.msk.f32.vlgmr.msra.gmra.mrb[4].mxu1 %vm272_vm1, %v4620_v21 }
 0x1ea   :  { %v3659_v22 = vpop.f32.mrb[2].mxu1 }
 0x1eb   :  { %v255_v23 = vpop.f32.mrb[3].mxu1  ;;  %v4628_v25 = vadd.f32 %v3659_v22, %v3321_v17 }
 0x1ec   :  { %v4626_v24 = vadd.f32 %v3321_v17, %v255_v23 }
 0x1ee   :  { %3671 = vmatprep.mubr.msk.f32.mxu1 %vm272_vm1, %v4626_v24 }
 0x1ef   :  { %3672 = vmatmul.mubr.msk.f32.gmra.mrb[6].mxu1 %vm272_vm1, %v4628_v25 }
 0x2ba   :  { %v3670_v37 = vpop.f32.mrb[4].mxu1 }
 0x2bb   :  { %v4651_v40 = vadd.f32 %v3670_v37, %v269_v35  ;;  %v351_v41 = vpop.f32.mrb[5].mxu1 }
 0x2bc   :  { %v4653_v42 = vadd.f32 %v351_v41, %v268_v36 }
 0x2bd   :  { %v379_v62 = vmul.f32 %v4647_v38, %v4651_v40  ;;  %v673_v63 = vmul.f32 %v4649_v39, %v4651_v40 }
 0x2be   :  { %v4657_v43 = vpack.i.bf16 %v4651_v40, %v4653_v42  ;;  %v378_v44 = vmul.f32 %v4647_v38, %v4653_v42  ;;  %v672_v45 = vmul.f32 %v4649_v39, %v4653_v42 }
 0x2c0   :  { %4298 = vrot.lane.b32.xlu0 %v4657_v43, %s4434_s28  ;;  %3682 = vmatprep.mubr.msk.f32.mxu1 %vm272_vm1, %v378_v44 }
 0x2c1   :  { %3710 = vmatprep.mubr.msk.f32.mxu0 %vm272_vm1, %v672_v45 }
 0x2c2   :  { %v3673_v48 = vpop.f32.mrb[6].mxu1 }
 0x2c3   :  { %v4673_v49 = vadd.f32 %v3673_v48, %v271_v46  ;;  %v361_v50 = vpop.f32.mrb[7].mxu1 }
 0x2c4   :  { %v4675_v51 = vadd.f32 %v361_v50, %v270_v47 }
 0x2c5   :  { %v381_v3 = vmul.f32 %v4647_v38, %v4673_v49  ;;  %v675_v4 = vmul.f32 %v4649_v39, %v4673_v49 }
 0x2c6   :  { %v4679_v52 = vpack.i.bf16 %v4673_v49, %v4675_v51  ;;  %v380_v1 = vmul.f32 %v4647_v38, %v4675_v51  ;;  %v674_v2 = vmul.f32 %v4649_v39, %v4675_v51 }
 0x2c8   :  { %4303 = vrot.lane.b32.xlu0 %v4679_v52, %s4434_s28 }
 0x332   :  { %v4299_v53 = vpop.permute.xlu0 %4298 }
 0x333   :  { %v4301_v54 = vunpack.i.h.bf16 %v4299_v53  ;;  %v4300_v55 = vunpack.i.l.bf16 %v4299_v53 }
 0x335   :  { %v4689_v57 = vpack.c.bf16 %v4301_v54, %v4300_v55 }
 0x337   :  { %4074 = vmatprep.subr.msk.bf16.mxu1 %vm4685_vm2, %v4689_v57  ;;  %4094 = vmatprep.subr.msk.bf16.mxu0 %vm4685_vm2, %v4689_v57 }
 0x338   :  { %4077 = vmatpush3.bf16.xpose.msk.msra.mxu1 %vm4685_vm2, %v4689_v57  ;;  %4097 = vmatpush3.bf16.xpose.msk.msra.mxu0 %vm4685_vm2, %v4689_v57 }
 0x33a   :  { %v4304_v58 = vpop.permute.xlu0 %4303 }
 0x33b   :  { %v4306_v59 = vunpack.i.h.bf16 %v4304_v58  ;;  %v4305_v60 = vunpack.i.l.bf16 %v4304_v58 }
 0x33d   :  { %v4703_v61 = vpack.c.bf16 %v4306_v59, %v4305_v60 }
 0x33f   :  { %4080 = vmatprep.subr.msk.bf16.mxu1 %vm4685_vm2, %v4703_v61  ;;  %4100 = vmatprep.subr.msk.bf16.mxu0 %vm4685_vm2, %v4703_v61 }
 0x340   :  { %4083 = vmatpush3.bf16.xpose.msk.msra.mxu1 %vm4685_vm2, %v4703_v61  ;;  %4103 = vmatpush3.bf16.xpose.msk.msra.mxu0 %vm4685_vm2, %v4703_v61 }
 0x347   :  { %3683 = vmatmul.mubr.msk.f32.vlgmr.msra.gmra.mrb[8].mxu1 %vm272_vm1, %v379_v62  ;;  %3711 = vmatmul.mubr.msk.f32.vlgmr.msra.gmra.mrb[8].mxu0 %vm272_vm1, %v673_v63 }
 0x348   :  { %3685 = vmatprep.mubr.msk.f32.mxu1 %vm272_vm1, %v380_v1  ;;  %3713 = vmatprep.mubr.msk.f32.mxu0 %vm272_vm1, %v674_v2 }
 0x34b   :  { %3686 = vmatmul.mubr.msk.f32.gmra.mrb[10].mxu1 %vm272_vm1, %v381_v3  ;;  %3714 = vmatmul.mubr.msk.f32.gmra.mrb[10].mxu0 %vm272_vm1, %v675_v4 }
 0x41a   :  { %v3684_v5 = vpop.f32.mrb[8].mxu1  ;;  %v3712_v6 = vpop.f32.mrb[8].mxu0 }
 0x41b   :  { %v480_v7 = vpop.f32.mrb[9].mxu1  ;;  %v754_v8 = vpop.f32.mrb[9].mxu0  ;;  %v500_v10 = vmul.f32 0.35355338, %v3684_v5  ;;  %v774_v35 = vmul.f32 0.35355338, %v3712_v6 }
 0x41c   :  { %v499_v11 = vmul.f32 0.35355338, %v480_v7  ;;  %v773_v29 = vmul.f32 0.35355338, %v754_v8 }
 0x41d   :  { %v504_v26 = vadd.f32 %v500_v10, %v4743_v12  ;;  %v778_v45 = vadd.f32 %v774_v35, %v4743_v12 }
 0x41e   :  { %v3687_v13 = vpop.f32.mrb[10].mxu1  ;;  %v3715_v14 = vpop.f32.mrb[10].mxu0  ;;  %v503_v15 = vadd.f32 %v499_v11, %v4738_v9  ;;  %v777_v37 = vadd.f32 %v773_v29, %v4738_v9 }
 0x41f   :  { %v490_v16 = vpop.f32.mrb[11].mxu1  ;;  %v764_v17 = vpop.f32.mrb[11].mxu0  ;;  %v502_v19 = vmul.f32 0.35355338, %v3687_v13  ;;  %v510_v30 = vsel %vm272_vm1, %v504_v26, -inf  ;;  %v784_v47 = vsel %vm272_vm1, %v778_v45, -inf }
 0x420   :  { %v501_v22 = vmul.f32 0.35355338, %v490_v16  ;;  %v507_v23 = vsel %vm272_vm1, %v503_v15, -inf  ;;  %v775_v41 = vmul.f32 0.35355338, %v764_v17  ;;  %v781_v44 = vsel %vm272_vm1, %v777_v37, -inf }
 0x421   :  { %508 = vmax.xlane.f32.xlu1 %v507_v23  ;;  %v506_v34 = vadd.f32 %v502_v19, %v4756_v27  ;;  %v776_v46 = vmul.f32 0.35355338, %v3715_v14 }
 0x422   :  { %v505_v28 = vadd.f32 %v501_v22, %v4749_v18  ;;  %v779_v48 = vadd.f32 %v775_v41, %v4749_v18 }
 0x423   :  { %v516_v36 = vsel %vm272_vm1, %v506_v34, -inf  ;;  %v780_v53 = vadd.f32 %v776_v46, %v4756_v27 }
 0x424   :  { %v513_v33 = vsel %vm272_vm1, %v505_v28, -inf  ;;  %v787_v50 = vsel %vm272_vm1, %v779_v48, -inf }
 0x425   :  { %511 = vmax.xlane.f32.xlu1 %v510_v30  ;;  %514 = vmax.xlane.f32.xlu0 %v513_v33  ;;  %v790_v54 = vsel %vm272_vm1, %v780_v53, -inf }
 0x429   :  { %517 = vmax.xlane.f32.xlu1 %v516_v36 }
 0x42d   :  { %782 = vmax.xlane.f32.xlu1 %v781_v44 }
 0x431   :  { %785 = vmax.xlane.f32.xlu1 %v784_v47 }
 0x435   :  { %788 = vmax.xlane.f32.xlu1 %v787_v50 }
 0x439   :  { %791 = vmax.xlane.f32.xlu1 %v790_v54 }
 0x4ae   :  { %v509_v55 = vpop.xlane.xlu1 %508 }
 0x4af   :  { %v519_v58 = vsub.f32 %v503_v15, %v509_v55 }
 0x4b1   :  { %v523_v62 = vmul.f32 1.442695, %v519_v58 }
 0x4b2   :  { %v512_v59 = vpop.xlane.xlu1 %511  ;;  %v515_v1 = vpop.xlane.xlu0 %514 }
 0x4b3   :  { %v520_v60 = vsub.f32 %v504_v26, %v512_v59  ;;  %v521_v3 = vsub.f32 %v505_v28, %v515_v1 }
 0x4b5   :  { %v525_v63 = vmul.f32 1.442695, %v520_v60  ;;  %v527_v6 = vmul.f32 1.442695, %v521_v3 }
 0x4b6   :  { %v518_v2 = vpop.xlane.xlu1 %517 }
 0x4b7   :  { %4327 = vpow2.f32 %v525_v63  ;;  %v522_v7 = vsub.f32 %v506_v34, %v518_v2 }
 0x4b8   :  { %4329 = vpow2.f32 %v523_v62 }
 0x4b9   :  { %v529_v14 = vmul.f32 1.442695, %v522_v7 }
 0x4ba   :  { %v783_v4 = vpop.xlane.xlu1 %782 }
 0x4bb   :  { %v793_v5 = vsub.f32 %v777_v37, %v783_v4 }
 0x4bd   :  { %v797_v8 = vmul.f32 1.442695, %v793_v5 }
 0x4be   :  { %v786_v10 = vpop.xlane.xlu1 %785 }
 0x4bf   :  { %4331 = vpow2.f32 %v797_v8  ;;  %v794_v11 = vsub.f32 %v778_v45, %v786_v10 }
 0x4c0   :  { %4333 = vpow2.f32 %v527_v6 }
 0x4c1   :  { %v4771_v13 = vpop.eup %4327  ;;  %v799_v15 = vmul.f32 1.442695, %v794_v11 }
 0x4c2   :  { %v534_v16 = vsel %vm272_vm1, %v4771_v13, 0.0  ;;  %v4330_v17 = vpop.eup %4329  ;;  %v789_v35 = vpop.xlane.xlu1 %788 }
 0x4c3   :  { %4335 = vpow2.f32 %v799_v15  ;;  %535 = vadd.xlane.f32.xlu1 %v534_v16  ;;  %v531_v19 = vsel %vm272_vm1, %v4330_v17, 0.0  ;;  %v795_v36 = vsub.f32 %v779_v48, %v789_v35  ;;  %v936_v35 = vmul.f32 %v4637_v31, %v4675_v51 }
 0x4c4   :  { %4337 = vpow2.f32 %v529_v14 }
 0x4c5   :  { %v801_v41 = vmul.f32 1.442695, %v795_v36  ;;  %v937_v36 = vmul.f32 %v4637_v31, %v4673_v49 }
 0x4c6   :  { %v792_v37 = vpop.xlane.xlu1 %791 }
 0x4c7   :  { %532 = vadd.xlane.f32.xlu1 %v531_v19  ;;  %v796_v44 = vsub.f32 %v780_v53, %v792_v37  ;;  %4339 = vpow2.f32 %v801_v41 }
 0x4c9   :  { %v4776_v22 = vpop.eup %4331  ;;  %v803_v45 = vmul.f32 1.442695, %v796_v44 }
 0x4ca   :  { %v805_v23 = vsel %vm272_vm1, %v4776_v22, 0.0  ;;  %v4780_v26 = vpop.eup %4333 }
 0x4cb   :  { %806 = vadd.xlane.f32.xlu1 %v805_v23  ;;  %v537_v30 = vsel %vm272_vm1, %v4780_v26, 0.0  ;;  %4341 = vpow2.f32 %v803_v45 }
 0x4cd   :  { %v4782_v28 = vpop.eup %4335 }
 0x4ce   :  { %v808_v29 = vsel %vm272_vm1, %v4782_v28, 0.0  ;;  %v4788_v33 = vpop.eup %4337 }
 0x4cf   :  { %809 = vadd.xlane.f32.xlu0 %v808_v29  ;;  %538 = vadd.xlane.f32.xlu1 %v537_v30  ;;  %v540_v34 = vsel %vm272_vm1, %v4788_v33, 0.0 }
 0x4d1   :  { %v4794_v46 = vpop.eup %4339 }
 0x4d2   :  { %v811_v47 = vsel %vm272_vm1, %v4794_v46, 0.0 }
 0x4d3   :  { %541 = vadd.xlane.f32.xlu0 %v540_v34  ;;  %v935_v34 = vmul.f32 %v4637_v31, %v4651_v40 }
 0x4d5   :  { %v4798_v50 = vpop.eup %4341 }
 0x4e0   :  { %4308 = vrot.lane.b32.xlu1 %v4657_v43, %s4435_s13  ;;  %v814_v43 = vsel %vm272_vm1, %v4798_v50, 0.0 }
 0x4e9   :  { %4313 = vrot.lane.b32.xlu0 %v4679_v52, %s4435_s13 }
 0x504   :  { %812 = vadd.xlane.f32.xlu1 %v811_v47 }
 0x508   :  { %815 = vadd.xlane.f32.xlu0 %v814_v43 }
 0x550   :  { %v536_v52 = vpop.xlane.xlu1 %535 }
 0x554   :  { %v533_v48 = vpop.xlane.xlu1 %532 }
 0x555   :  { %4343 = vrcp.f32 %v533_v48 }
 0x556   :  { %4345 = vrcp.f32 %v536_v52 }
 0x558   :  { %v807_v54 = vpop.xlane.xlu1 %806 }
 0x55c   :  { %v539_v53 = vpop.xlane.xlu1 %538  ;;  %v810_v55 = vpop.xlane.xlu0 %809 }
 0x55d   :  { %4347 = vrcp.f32 %v539_v53 }
 0x55f   :  { %v4344_v58 = vpop.eup %4343 }
 0x560   :  { %v4309_v59 = vpop.permute.xlu1 %4308  ;;  %v542_v60 = vpop.xlane.xlu0 %541  ;;  %v547_v62 = vmul.f32 %v4344_v58, %v4330_v17 }
 0x561   :  { %v4311_v63 = vunpack.i.h.bf16 %v4309_v59  ;;  %v4310_v1 = vunpack.i.l.bf16 %v4309_v59  ;;  %4349 = vrcp.f32 %v542_v60  ;;  %v4346_v7 = vpop.eup %4345 }
 0x562   :  { %3696 = vmatprep.mubr.msk.f32.mxu1 %vm272_vm1, %v547_v62  ;;  %4351 = vrcp.f32 %v807_v54  ;;  %v548_v10 = vmul.f32 %v4346_v7, %v4771_v13 }
 0x563   :  { %v4084_v2 = vpack.c.bf16 %v4311_v63, %v4310_v1  ;;  %4353 = vrcp.f32 %v810_v55 }
 0x564   :  { %v4314_v3 = vpop.permute.xlu0 %4313 }
 0x565   :  { %v4316_v4 = vunpack.i.h.bf16 %v4314_v3  ;;  %v4315_v5 = vunpack.i.l.bf16 %v4314_v3  ;;  %4085 = vmatprep.subr.bf16.mxu1 %v4084_v2  ;;  %4125 = vmatprep.subr.bf16.mxu0 %v4084_v2 }
 0x566   :  { %4087 = vmatpush3.bf16.msra.mxu1 %v4084_v2  ;;  %4127 = vmatpush3.bf16.msra.mxu0 %v4084_v2 }
 0x567   :  { %v4088_v6 = vpack.c.bf16 %v4316_v4, %v4315_v5  ;;  %v4348_v8 = vpop.eup %4347 }
 0x568   :  { %v549_v14 = vmul.f32 %v4348_v8, %v4780_v26 }
 0x569   :  { %4089 = vmatprep.subr.bf16.mxu1 %v4088_v6  ;;  %4129 = vmatprep.subr.bf16.mxu0 %v4088_v6 }
 0x56a   :  { %4091 = vmatpush3.bf16.msra.mxu1 %v4088_v6  ;;  %4131 = vmatpush3.bf16.msra.mxu0 %v4088_v6 }
 0x56b   :  { %4105 = vmatprep.subr.bf16.mxu1 %v4084_v2  ;;  %4134 = vmatprep.subr.msk.bf16.mxu0 %vm4685_vm2, %v4689_v57  ;;  %v4350_v11 = vpop.eup %4349 }
 0x56c   :  { %v4352_v15 = vpop.eup %4351  ;;  %v550_v16 = vmul.f32 %v4350_v11, %v4788_v33  ;;  %v934_v33 = vmul.f32 %v4637_v31, %v4653_v42 }
 0x56d   :  { %3697 = vmatmul.mubr.msk.f32.vlgmr.msra.gmra.mrb[12].mxu1 %vm272_vm1, %v548_v10  ;;  %v4354_v17 = vpop.eup %4353  ;;  %v821_v13 = vmul.f32 %v4352_v15, %v4776_v22 }
 0x56e   :  { %3699 = vmatprep.mubr.msk.f32.mxu1 %vm272_vm1, %v549_v14  ;;  %4107 = vmatpush3.bf16.msra.mxu1 %v4084_v2  ;;  %v822_v19 = vmul.f32 %v4354_v17, %v4782_v28 }
 0x56f   :  { %4109 = vmatprep.subr.bf16.mxu1 %v4088_v6 }
 0x571   :  { %3700 = vmatmul.mubr.msk.f32.gmra.mrb[14].mxu1 %vm272_vm1, %v550_v16 }
 0x572   :  { %4111 = vmatpush3.bf16.msra.mxu1 %v4088_v6  ;;  %3724 = vmatprep.mubr.msk.f32.mxu1 %vm272_vm1, %v821_v13 }
 0x573   :  { %4114 = vmatprep.subr.msk.bf16.mxu1 %vm4685_vm2, %v4689_v57 }
 0x575   :  { %3725 = vmatmul.mubr.msk.f32.vlgmr.msra.gmra.mrb[16].mxu1 %vm272_vm1, %v822_v19 }
 0x57b   :  { %4117 = vmatpush3.bf16.xpose.msk.msra.mxu1 %vm4685_vm2, %v4689_v57 }
 0x57c   :  { %4120 = vmatprep.subr.msk.bf16.mxu1 %vm4685_vm2, %v4703_v61 }
 0x583   :  { %4123 = vmatpush3.bf16.xpose.msk.msra.mxu1 %vm4685_vm2, %v4703_v61 }
 0x584   :  { %4145 = vmatprep.subr.bf16.mxu1 %v4084_v2 }
 0x591   :  { %v813_v22 = vpop.xlane.xlu1 %812 }
 0x592   :  { %4355 = vrcp.f32 %v813_v22 }
 0x595   :  { %v816_v23 = vpop.xlane.xlu0 %815 }
 0x596   :  { %4357 = vrcp.f32 %v816_v23 }
 0x59c   :  { %v4356_v26 = vpop.eup %4355 }
 0x59d   :  { %v823_v28 = vmul.f32 %v4356_v26, %v4794_v46 }
 0x59f   :  { %3727 = vmatprep.mubr.msk.f32.mxu1 %vm272_vm1, %v823_v28 }
 0x5a0   :  { %v4358_v29 = vpop.eup %4357 }
 0x5a1   :  { %v824_v30 = vmul.f32 %v4358_v29, %v4798_v50 }
 0x5a3   :  { %3728 = vmatmul.mubr.msk.f32.gmra.mrb[18].mxu1 %vm272_vm1, %v824_v30 }
 0x5a4   :  { %3738 = vmatprep.mubr.msk.f32.mxu1 %vm272_vm1, %v934_v33 }
 0x5a7   :  { %3739 = vmatmul.mubr.msk.f32.vlgmr.msra.gmra.mrb[20].mxu1 %vm272_vm1, %v935_v34 }
 0x5a8   :  { %4147 = vmatpush3.bf16.msra.mxu1 %v4084_v2  ;;  %3741 = vmatprep.mubr.msk.f32.mxu1 %vm272_vm1, %v936_v35 }
 0x5a9   :  { %4149 = vmatprep.subr.bf16.mxu1 %v4088_v6 }
 0x5ab   :  { %3742 = vmatmul.mubr.msk.f32.gmra.mrb[22].mxu1 %vm272_vm1, %v937_v36 }
 0x5ac   :  { %4151 = vmatpush3.bf16.msra.mxu1 %v4088_v6 }
 0x640   :  { %v3698_v37 = vpop.f32.mrb[12].mxu1 }
 0x641   :  { %v641_v41 = vpop.f32.mrb[13].mxu1  ;;  %v661_v47 = vmul.f32 %v3698_v37, %v4647_v38 }
 0x642   :  { %v660_v52 = vmul.f32 %v641_v41, %v4647_v38 }
 0x644   :  { %v3701_v44 = vpop.f32.mrb[14].mxu1 }
 0x645   :  { %v651_v45 = vpop.f32.mrb[15].mxu1  ;;  %v663_v58 = vmul.f32 %v3701_v44, %v4647_v38 }
 0x646   :  { %v662_v62 = vmul.f32 %v651_v45, %v4647_v38 }
 0x648   :  { %v3726_v46 = vpop.f32.mrb[16].mxu1 }
 0x649   :  { %v923_v50 = vmul.f32 %v3726_v46, %v4649_v39  ;;  %v903_v43 = vpop.f32.mrb[17].mxu1 }
 0x64a   :  { %v922_v48 = vmul.f32 %v903_v43, %v4649_v39 }
 0x64b   :  { %v4848_v54 = vadd.f32 %v923_v50, %v661_v47 }
 0x64c   :  { %v4850_v53 = vadd.f32 %v922_v48, %v660_v52 }
 0x676   :  { %v3729_v55 = vpop.f32.mrb[18].mxu1 }
 0x677   :  { %v925_v59 = vmul.f32 %v3729_v55, %v4649_v39  ;;  %v913_v60 = vpop.f32.mrb[19].mxu1 }
 0x678   :  { %v924_v63 = vmul.f32 %v913_v60, %v4649_v39 }
 0x679   :  { %v4856_v1 = vadd.f32 %v925_v59, %v663_v58 }
 0x67a   :  { %v4858_v2 = vadd.f32 %v924_v63, %v662_v62  ;;  %v3740_v3 = vpop.f32.mrb[20].mxu1 }
 0x67b   :  { %v1036_v4 = vmul.f32 0.35355338, %v3740_v3  ;;  %v1016_v5 = vpop.f32.mrb[21].mxu1 }
 0x67c   :  { %v1035_v6 = vmul.f32 0.35355338, %v1016_v5 }
 0x67d   :  { %v1040_v7 = vadd.f32 %v1036_v4, %v4743_v12 }
 0x67e   :  { %v3743_v8 = vpop.f32.mrb[22].mxu1  ;;  %v1039_v10 = vadd.f32 %v1035_v6, %v4738_v9 }
 0x67f   :  { %v1038_v11 = vmul.f32 0.35355338, %v3743_v8  ;;  %v1026_v14 = vpop.f32.mrb[23].mxu1  ;;  %v1046_v15 = vsel %vm272_vm1, %v1040_v7, -inf }
 0x680   :  { %v1037_v16 = vmul.f32 0.35355338, %v1026_v14  ;;  %1047 = vmax.xlane.f32.xlu0 %v1046_v15  ;;  %v1043_v17 = vsel %vm272_vm1, %v1039_v10, -inf  ;;  %v1196_v14 = vmul.f32 %v4639_v32, %v4653_v42  ;;  %v1198_v15 = vmul.f32 %v4639_v32, %v4675_v51 }
 0x681   :  { %1044 = vmax.xlane.f32.xlu1 %v1043_v17  ;;  %v1042_v13 = vadd.f32 %v1038_v11, %v4756_v27  ;;  %v1199_v42 = vmul.f32 %v4639_v32, %v4673_v49 }
 0x682   :  { %v1041_v19 = vadd.f32 %v1037_v16, %v4749_v18 }
 0x683   :  { %v1052_v22 = vsel %vm272_vm1, %v1042_v13, -inf }
 0x684   :  { %1053 = vmax.xlane.f32.xlu0 %v1052_v22  ;;  %v1049_v23 = vsel %vm272_vm1, %v1041_v19, -inf }
 0x685   :  { %1050 = vmax.xlane.f32.xlu1 %v1049_v23 }
 0x70d   :  { %v1048_v26 = vpop.xlane.xlu0 %1047 }
 0x70e   :  { %v1056_v28 = vsub.f32 %v1040_v7, %v1048_v26  ;;  %v1045_v29 = vpop.xlane.xlu1 %1044 }
 0x70f   :  { %v1055_v30 = vsub.f32 %v1039_v10, %v1045_v29 }
 0x710   :  { %v1061_v33 = vmul.f32 1.442695, %v1056_v28 }
 0x711   :  { %v1059_v34 = vmul.f32 1.442695, %v1055_v30  ;;  %v1054_v35 = vpop.xlane.xlu0 %1053 }
 0x712   :  { %4359 = vpow2.f32 %v1061_v33  ;;  %v1058_v36 = vsub.f32 %v1042_v13, %v1054_v35  ;;  %v1051_v37 = vpop.xlane.xlu1 %1050 }
 0x713   :  { %4361 = vpow2.f32 %v1059_v34  ;;  %v1057_v41 = vsub.f32 %v1041_v19, %v1051_v37 }
 0x714   :  { %v1065_v44 = vmul.f32 1.442695, %v1058_v36 }
 0x715   :  { %v1063_v45 = vmul.f32 1.442695, %v1057_v41 }
 0x716   :  { %4363 = vpow2.f32 %v1065_v44 }
 0x717   :  { %4365 = vpow2.f32 %v1063_v45 }
 0x71c   :  { %v4360_v46 = vpop.eup %4359 }
 0x71d   :  { %v4362_v47 = vpop.eup %4361  ;;  %v1070_v50 = vsel %vm272_vm1, %v4360_v46, 0.0 }
 0x71e   :  { %1071 = vadd.xlane.f32.xlu0 %v1070_v50  ;;  %v1067_v43 = vsel %vm272_vm1, %v4362_v47, 0.0 }
 0x71f   :  { %1068 = vadd.xlane.f32.xlu1 %v1067_v43 }
 0x720   :  { %v4364_v52 = vpop.eup %4363 }
 0x721   :  { %v4366_v48 = vpop.eup %4365  ;;  %v1076_v55 = vsel %vm272_vm1, %v4364_v52, 0.0 }
 0x722   :  { %1077 = vadd.xlane.f32.xlu0 %v1076_v55  ;;  %v1073_v58 = vsel %vm272_vm1, %v4366_v48, 0.0 }
 0x723   :  { %1074 = vadd.xlane.f32.xlu1 %v1073_v58 }
 0x7ab   :  { %v1072_v59 = vpop.xlane.xlu0 %1071 }
 0x7ac   :  { %4367 = vrcp.f32 %v1072_v59  ;;  %v1069_v60 = vpop.xlane.xlu1 %1068 }
 0x7ad   :  { %4369 = vrcp.f32 %v1069_v60 }
 0x7af   :  { %v1078_v62 = vpop.xlane.xlu0 %1077 }
 0x7b0   :  { %4371 = vrcp.f32 %v1078_v62  ;;  %v1075_v63 = vpop.xlane.xlu1 %1074 }
 0x7b1   :  { %4373 = vrcp.f32 %v1075_v63 }
 0x7b6   :  { %v4368_v3 = vpop.eup %4367 }
 0x7b7   :  { %v4370_v4 = vpop.eup %4369  ;;  %v1084_v6 = vmul.f32 %v4368_v3, %v4360_v46 }
 0x7b8   :  { %v1083_v5 = vmul.f32 %v4370_v4, %v4362_v47 }
 0x7ba   :  { %v4372_v7 = vpop.eup %4371  ;;  %3752 = vmatprep.mubr.msk.f32.mxu0 %vm272_vm1, %v1083_v5 }
 0x7bb   :  { %v4374_v8 = vpop.eup %4373  ;;  %3753 = vmatmul.mubr.msk.f32.vlgmr.msra.gmra.mrb[12].mxu0 %vm272_vm1, %v1084_v6  ;;  %v1086_v11 = vmul.f32 %v4372_v7, %v4364_v52 }
 0x7bc   :  { %4137 = vmatpush3.bf16.xpose.msk.msra.mxu0 %vm4685_vm2, %v4689_v57  ;;  %v1085_v10 = vmul.f32 %v4374_v8, %v4366_v48  ;;  %v1197_v57 = vmul.f32 %v4639_v32, %v4651_v40 }
 0x7bd   :  { %4140 = vmatprep.subr.msk.bf16.mxu0 %vm4685_vm2, %v4703_v61 }
 0x7be   :  { %3755 = vmatprep.mubr.msk.f32.mxu0 %vm272_vm1, %v1085_v10  ;;  %v1454_v10 = vld [vmem:[%s5354_s1 + $0x120] sm:$0xff] }
 0x7bf   :  { %3756 = vmatmul.mubr.msk.f32.gmra.mrb[14].mxu0 %vm272_vm1, %v1086_v11  ;;  %v1455_v11 = vld [vmem:[%s5354_s1 + $0x128] sm:$0xff] }
 0x7c0   :  { %3766 = vmatprep.mubr.msk.f32.mxu0 %vm272_vm1, %v1196_v14  ;;  %v4152_v14 = vpack.c.bf16 %v1455_v11, %v1454_v10 }
 0x7c2   :  { %4153 = vmatprep.subr.bf16.mxu1 %v4152_v14 }
 0x7c4   :  { %4143 = vmatpush3.bf16.xpose.msk.msra.mxu0 %vm4685_vm2, %v4703_v61 }
 0x7cb   :  { %3767 = vmatmul.mubr.msk.f32.vlgmr.msra.gmra.mrb[16].mxu0 %vm272_vm1, %v1197_v57 }
 0x7cc   :  { %3769 = vmatprep.mubr.msk.f32.mxu0 %vm272_vm1, %v1198_v15 }
 0x7cf   :  { %3770 = vmatmul.mubr.msk.f32.gmra.mrb[18].mxu0 %vm272_vm1, %v1199_v42 }
 0x88e   :  { %v3754_v16 = vpop.f32.mrb[12].mxu0 }
 0x88f   :  { %v1185_v17 = vmul.f32 %v3754_v16, %v4637_v31  ;;  %v1165_v13 = vpop.f32.mrb[13].mxu0 }
 0x890   :  { %v1184_v61 = vmul.f32 %v1165_v13, %v4637_v31 }
 0x891   :  { %v4900_v40 = vadd.f32 %v1185_v17, %v4848_v54 }
 0x892   :  { %v4903_v51 = vadd.f32 %v1184_v61, %v4850_v53  ;;  %v3757_v19 = vpop.f32.mrb[14].mxu0 }
 0x893   :  { %v1187_v22 = vmul.f32 %v3757_v19, %v4637_v31  ;;  %v1175_v23 = vpop.f32.mrb[15].mxu0 }
 0x894   :  { %v1186_v49 = vmul.f32 %v1175_v23, %v4637_v31 }
 0x895   :  { %v4908_v26 = vadd.f32 %v1187_v22, %v4856_v1 }
 0x896   :  { %v4911_v28 = vadd.f32 %v1186_v49, %v4858_v2 }
 0x89e   :  { %v3768_v29 = vpop.f32.mrb[16].mxu0 }
 0x89f   :  { %v1298_v30 = vmul.f32 0.35355338, %v3768_v29  ;;  %v1278_v33 = vpop.f32.mrb[17].mxu0 }
 0x8a0   :  { %v1297_v54 = vmul.f32 0.35355338, %v1278_v33  ;;  %v1457_v33 = vld [vmem:[%s5354_s1 + $0x138] sm:$0xff] }
 0x8a1   :  { %v1302_v34 = vadd.f32 %v1298_v30, %v4743_v12  ;;  %v1456_v30 = vld [vmem:[%s5354_s1 + $0x130] sm:$0xff] }
 0x8a2   :  { %v3771_v53 = vpop.f32.mrb[18].mxu0  ;;  %v1301_v35 = vadd.f32 %v1297_v54, %v4738_v9  ;;  %v4156_v54 = vpack.c.bf16 %v1457_v33, %v1456_v30  ;;  %v1749_v30 = vld [vmem:[%s5354_s1 + $0x160] sm:$0xff]  ;;  %v1750_v33 = vld [vmem:[%s5354_s1 + $0x168] sm:$0xff] }
 0x8a3   :  { %v1300_v36 = vmul.f32 0.35355338, %v3771_v53  ;;  %v1288_v37 = vpop.f32.mrb[19].mxu0  ;;  %v1308_v41 = vsel %vm272_vm1, %v1302_v34, -inf }
 0x8a4   :  { %v1299_v44 = vmul.f32 0.35355338, %v1288_v37  ;;  %1309 = vmax.xlane.f32.xlu0 %v1308_v41  ;;  %v1305_v1 = vsel %vm272_vm1, %v1301_v35, -inf }
 0x8a5   :  { %1306 = vmax.xlane.f32.xlu1 %v1305_v1  ;;  %v1304_v2 = vadd.f32 %v1300_v36, %v4756_v27 }
 0x8a6   :  { %v1303_v45 = vadd.f32 %v1299_v44, %v4749_v18 }
 0x8a7   :  { %v1314_v46 = vsel %vm272_vm1, %v1304_v2, -inf }
 0x8a8   :  { %1315 = vmax.xlane.f32.xlu0 %v1314_v46  ;;  %v1311_v12 = vsel %vm272_vm1, %v1303_v45, -inf }
 0x8a9   :  { %1312 = vmax.xlane.f32.xlu1 %v1311_v12 }
 0x931   :  { %v1310_v9 = vpop.xlane.xlu0 %1309 }
 0x932   :  { %v1318_v47 = vsub.f32 %v1302_v34, %v1310_v9  ;;  %v1307_v50 = vpop.xlane.xlu1 %1306 }
 0x933   :  { %v1317_v43 = vsub.f32 %v1301_v35, %v1307_v50 }
 0x934   :  { %v1323_v52 = vmul.f32 1.442695, %v1318_v47 }
 0x935   :  { %v1321_v48 = vmul.f32 1.442695, %v1317_v43  ;;  %v1316_v55 = vpop.xlane.xlu0 %1315 }
 0x936   :  { %4375 = vpow2.f32 %v1323_v52  ;;  %v1320_v58 = vsub.f32 %v1304_v2, %v1316_v55  ;;  %v1313_v59 = vpop.xlane.xlu1 %1312 }
 0x937   :  { %4377 = vpow2.f32 %v1321_v48  ;;  %v1319_v27 = vsub.f32 %v1303_v45, %v1313_v59 }
 0x938   :  { %v1327_v60 = vmul.f32 1.442695, %v1320_v58 }
 0x939   :  { %v1325_v18 = vmul.f32 1.442695, %v1319_v27 }
 0x93a   :  { %4379 = vpow2.f32 %v1327_v60 }
 0x93b   :  { %4381 = vpow2.f32 %v1325_v18 }
 0x940   :  { %v4376_v62 = vpop.eup %4375 }
 0x941   :  { %v4378_v63 = vpop.eup %4377  ;;  %v1332_v3 = vsel %vm272_vm1, %v4376_v62, 0.0 }
 0x942   :  { %1333 = vadd.xlane.f32.xlu0 %v1332_v3  ;;  %v1329_v4 = vsel %vm272_vm1, %v4378_v63, 0.0 }
 0x943   :  { %1330 = vadd.xlane.f32.xlu1 %v1329_v4 }
 0x944   :  { %v4380_v5 = vpop.eup %4379 }
 0x945   :  { %v4382_v6 = vpop.eup %4381  ;;  %v1338_v7 = vsel %vm272_vm1, %v4380_v5, 0.0 }
 0x946   :  { %1339 = vadd.xlane.f32.xlu0 %v1338_v7  ;;  %v1335_v8 = vsel %vm272_vm1, %v4382_v6, 0.0 }
 0x947   :  { %1336 = vadd.xlane.f32.xlu1 %v1335_v8 }
 0x9cf   :  { %v1334_v57 = vpop.xlane.xlu0 %1333 }
 0x9d0   :  { %4383 = vrcp.f32 %v1334_v57  ;;  %v1331_v15 = vpop.xlane.xlu1 %1330 }
 0x9d1   :  { %4385 = vrcp.f32 %v1331_v15 }
 0x9d3   :  { %v1340_v42 = vpop.xlane.xlu0 %1339 }
 0x9d4   :  { %4387 = vrcp.f32 %v1340_v42  ;;  %v1337_v16 = vpop.xlane.xlu1 %1336 }
 0x9d5   :  { %4389 = vrcp.f32 %v1337_v16 }
 0x9da   :  { %v4384_v17 = vpop.eup %4383 }
 0x9db   :  { %v4386_v13 = vpop.eup %4385  ;;  %v1346_v19 = vmul.f32 %v4384_v17, %v4376_v62 }
 0x9dc   :  { %v1345_v61 = vmul.f32 %v4386_v13, %v4378_v63 }
 0x9de   :  { %v4388_v22 = vpop.eup %4387  ;;  %3780 = vmatprep.mubr.msk.f32.mxu1 %vm272_vm1, %v1345_v61  ;;  %v1639_v61 = vld [vmem:[%s5354_s1 + $0x140] sm:$0xff] }
 0x9df   :  { %v4390_v23 = vpop.eup %4389  ;;  %3781 = vmatmul.mubr.msk.f32.vlgmr.msra.gmra.mrb[24].mxu1 %vm272_vm1, %v1346_v19  ;;  %v1348_v29 = vmul.f32 %v4388_v22, %v4380_v5  ;;  %v1640_v19 = vld [vmem:[%s5354_s1 + $0x148] sm:$0xff] }
 0x9e0   :  { %v1347_v49 = vmul.f32 %v4390_v23, %v4382_v6  ;;  %4155 = vmatpush3.bf16.msra.mxu1 %v4152_v14  ;;  %v4160_v22 = vpack.c.bf16 %v1640_v19, %v1639_v61  ;;  %v1641_v23 = vld [vmem:[%s5354_s1 + $0x150] sm:$0xff] }
 0x9e1   :  { %4157 = vmatprep.subr.bf16.mxu1 %v4156_v54 }
 0x9e2   :  { %3783 = vmatprep.mubr.msk.f32.mxu1 %vm272_vm1, %v1347_v49  ;;  %v1642_v49 = vld [vmem:[%s5354_s1 + $0x158] sm:$0xff]  ;;  %4161 = vmatprep.subr.bf16.mxu0 %v4160_v22 }
 0x9e3   :  { %3784 = vmatmul.mubr.msk.f32.gmra.mrb[26].mxu1 %vm272_vm1, %v1348_v29  ;;  %v4164_v29 = vpack.c.bf16 %v1642_v49, %v1641_v23  ;;  %4163 = vmatpush3.bf16.msra.mxu0 %v4160_v22  ;;  %v3394_v49 = vld [vmem:[%s5356_s2 + $0x26] ss:$0 sm:$0xff] }
 0x9e4   :  { %4159 = vmatpush3.bf16.msra.mxu1 %v4156_v54  ;;  %v1751_v54 = vld [vmem:[%s5354_s1 + $0x170] sm:$0xff] }
 0x9e5   :  { %4165 = vmatprep.subr.bf16.mxu0 %v4164_v29 }
 0x9e7   :  { %4167 = vmatpush3.bf16.msra.mxu0 %v4164_v29 }
 0xab2   :  { %v3782_v34 = vpop.f32.mrb[24].mxu1 }
 0xab3   :  { %v1447_v53 = vmul.f32 %v3782_v34, %v4639_v32  ;;  %v1427_v35 = vpop.f32.mrb[25].mxu1  ;;  %v4168_v34 = vpack.c.bf16 %v1750_v33, %v1749_v30 }
 0xab4   :  { %v1446_v36 = vmul.f32 %v1427_v35, %v4639_v32 }
 0xab5   :  { %v1451_v37 = vadd.f32 %v1447_v53, %v4900_v40  ;;  %v1752_v53 = vld [vmem:[%s5354_s1 + $0x178] sm:$0xff]  ;;  %4169 = vmatprep.subr.bf16.mxu1 %v4168_v34 }
 0xab6   :  { %v1450_v41 = vadd.f32 %v1446_v36, %v4903_v51  ;;  %v3785_v44 = vpop.f32.mrb[26].mxu1  ;;  %v3382_v51 = vld [vmem:[%s5356_s2 + $0x22] ss:$0 sm:$0xff]  ;;  %v4172_v35 = vpack.c.bf16 %v1752_v53, %v1751_v54 }
 0xab7   :  { %v1449_v1 = vmul.f32 %v3785_v44, %v4639_v32  ;;  %v1437_v2 = vpop.f32.mrb[27].mxu1  ;;  %v1753_v36 = vld [vmem:[%s5354_s1 + $0x180] sm:$0xff] }
 0xab8   :  { %v1448_v45 = vmul.f32 %v1437_v2, %v4639_v32  ;;  %3794 = vmatprep.mubr.msk.f32.mxu1 %vm272_vm1, %v1450_v41 }
 0xab9   :  { %v1453_v46 = vadd.f32 %v1449_v1, %v4908_v26  ;;  %3795 = vmatmul.mubr.msk.f32.vlgmr.msra.gmra.mrb[28].mxu1 %vm272_vm1, %v1451_v37  ;;  %v1754_v37 = vld [vmem:[%s5354_s1 + $0x188] sm:$0xff] }
 0xaba   :  { %v1452_v12 = vadd.f32 %v1448_v45, %v4911_v28  ;;  %4171 = vmatpush3.bf16.msra.mxu1 %v4168_v34  ;;  %v4176_v41 = vpack.c.bf16 %v1754_v37, %v1753_v36 }
 0xabb   :  { %4173 = vmatprep.subr.bf16.mxu1 %v4172_v35 }
 0xabc   :  { %3797 = vmatprep.mubr.msk.f32.mxu1 %vm272_vm1, %v1452_v12 }
 0xabd   :  { %3798 = vmatmul.mubr.msk.f32.gmra.mrb[30].mxu1 %vm272_vm1, %v1453_v46 }
 0xabe   :  { %4175 = vmatpush3.bf16.msra.mxu1 %v4172_v35 }
 0xabf   :  { %4177 = vmatprep.subr.bf16.mxu1 %v4176_v41 }
 0xac2   :  { %4179 = vmatpush3.bf16.msra.mxu1 %v4176_v41 }
 0xb8c   :  { %v3796_v40 = vpop.f32.mrb[28].mxu1 }
 0xb8d   :  { %v1556_v9 = vadd.f32 %v3796_v40, %v4620_v21  ;;  %v1536_v47 = vpop.f32.mrb[29].mxu1 }
 0xb8e   :  { %v1555_v50 = vadd.f32 %v1536_v47, %v4618_v20 }
 0xb8f   :  { %v1565_v43 = vadd.f32 %v3382_v51, %v1556_v9 }
 0xb90   :  { %v3799_v26 = vpop.f32.mrb[30].mxu1  ;;  %v1564_v52 = vadd.f32 %v3382_v51, %v1555_v50 }
 0xb91   :  { %v1558_v48 = vadd.f32 %v3799_v26, %v4628_v25  ;;  %v1546_v28 = vpop.f32.mrb[31].mxu1  ;;  %v1573_v55 = vsel %vm272_vm1, %v1565_v43, 0.0 }
 0xb92   :  { %v1557_v58 = vadd.f32 %v1546_v28, %v4626_v24  ;;  %1574 = vadd.xlane.f32.xlu0 %v1573_v55  ;;  %v1570_v59 = vsel %vm272_vm1, %v1564_v52, 0.0 }
 0xb93   :  { %1571 = vadd.xlane.f32.xlu1 %v1570_v59  ;;  %v1567_v27 = vadd.f32 %v3382_v51, %v1558_v48 }
 0xb94   :  { %v1566_v60 = vadd.f32 %v3382_v51, %v1557_v58  ;;  %v3384_v58 = vld [vmem:[%s5356_s2 + $0x24] ss:$0 sm:$0xff] }
 0xb95   :  { %v1579_v21 = vsel %vm272_vm1, %v1567_v27, 0.0 }
 0xb96   :  { %1580 = vadd.xlane.f32.xlu0 %v1579_v21  ;;  %v1576_v20 = vsel %vm272_vm1, %v1566_v60, 0.0 }
 0xb97   :  { %1577 = vadd.xlane.f32.xlu1 %v1576_v20 }
 0xc1f   :  { %v1575_v18 = vpop.xlane.xlu0 %1574 }
 0xc20   :  { %v1584_v62 = vmul.f32 0.03125, %v1575_v18  ;;  %v1572_v25 = vpop.xlane.xlu1 %1571 }
 0xc21   :  { %v1583_v63 = vmul.f32 0.03125, %v1572_v25 }
 0xc22   :  { %v4964_v3 = vsub.f32 %v1565_v43, %v1584_v62 }
 0xc23   :  { %v4966_v4 = vsub.f32 %v1564_v52, %v1583_v63  ;;  %v1581_v24 = vpop.xlane.xlu0 %1580  ;;  %v3383_v52 = vld [vmem:[%s5356_s2 + $0x23] ss:$0 sm:$0xff] }
 0xc24   :  { %v1586_v5 = vmul.f32 0.03125, %v1581_v24  ;;  %v1578_v6 = vpop.xlane.xlu1 %1577  ;;  %v1592_v7 = vmul.f32 %v4964_v3, %v4964_v3 }
 0xc25   :  { %v1585_v8 = vmul.f32 0.03125, %v1578_v6  ;;  %v1591_v10 = vmul.f32 %v4966_v4, %v4966_v4  ;;  %v1756_v6 = vld [vmem:[%s5354_s1 + $0x198] sm:$0xff] }
 0xc26   :  { %v4972_v11 = vsub.f32 %v1567_v27, %v1586_v5  ;;  %v1598_v14 = vsel %vm272_vm1, %v1592_v7, 0.0  ;;  %v1755_v5 = vld [vmem:[%s5354_s1 + $0x190] sm:$0xff] }
 0xc27   :  { %v4975_v57 = vsub.f32 %v1566_v60, %v1585_v8  ;;  %1599 = vadd.xlane.f32.xlu0 %v1598_v14  ;;  %v1595_v15 = vsel %vm272_vm1, %v1591_v10, 0.0  ;;  %v4180_v7 = vpack.c.bf16 %v1756_v6, %v1755_v5  ;;  %v3385_v8 = vld [vmem:[%s5356_s2 + $0x25] ss:$0 sm:$0xff] }
 0xc28   :  { %1596 = vadd.xlane.f32.xlu1 %v1595_v15  ;;  %v1594_v42 = vmul.f32 %v4972_v11, %v4972_v11 }
 0xc29   :  { %v1593_v16 = vmul.f32 %v4975_v57, %v4975_v57  ;;  %4181 = vmatprep.subr.bf16.mxu1 %v4180_v7 }
 0xc2a   :  { %v1604_v17 = vsel %vm272_vm1, %v1594_v42, 0.0  ;;  %4183 = vmatpush3.bf16.msra.mxu1 %v4180_v7 }
 0xc2b   :  { %1605 = vadd.xlane.f32.xlu0 %v1604_v17  ;;  %v1601_v13 = vsel %vm272_vm1, %v1593_v16, 0.0  ;;  %4200 = vmatprep.subr.bf16.mxu1 %v4433_v0 }
 0xc2c   :  { %1602 = vadd.xlane.f32.xlu1 %v1601_v13 }
 0xcb4   :  { %v1600_v44 = vpop.xlane.xlu0 %1599 }
 0xcb5   :  { %v1608_v1 = vmul.f32 0.03125, %v1600_v44  ;;  %v1597_v2 = vpop.xlane.xlu1 %1596 }
 0xcb6   :  { %v1607_v45 = vmul.f32 0.03125, %v1597_v2 }
 0xcb7   :  { %v1612_v46 = vadd.f32 1e-05, %v1608_v1 }
 0xcb8   :  { %v1611_v12 = vadd.f32 1e-05, %v1607_v45  ;;  %v1606_v40 = vpop.xlane.xlu0 %1605 }
 0xcb9   :  { %4391 = vrsqrt.f32 %v1612_v46  ;;  %v1610_v51 = vmul.f32 0.03125, %v1606_v40  ;;  %v1603_v9 = vpop.xlane.xlu1 %1602 }
 0xcba   :  { %4393 = vrsqrt.f32 %v1611_v12  ;;  %v1609_v47 = vmul.f32 0.03125, %v1603_v9 }
 0xcbb   :  { %v1614_v50 = vadd.f32 1e-05, %v1610_v51 }
 0xcbc   :  { %v1613_v43 = vadd.f32 1e-05, %v1609_v47 }
 0xcbd   :  { %4395 = vrsqrt.f32 %v1614_v50 }
 0xcbe   :  { %4397 = vrsqrt.f32 %v1613_v43 }
 0xcc3   :  { %v4392_v26 = vpop.eup %4391 }
 0xcc4   :  { %v4394_v48 = vpop.eup %4393  ;;  %v1620_v28 = vmul.f32 %v4392_v26, %v4964_v3 }
 0xcc5   :  { %v1619_v55 = vmul.f32 %v4394_v48, %v4966_v4 }
 0xcc6   :  { %v1628_v59 = vmul.f32 %v3383_v52, %v1620_v28 }
 0xcc7   :  { %v4396_v27 = vpop.eup %4395  ;;  %v1627_v60 = vmul.f32 %v3383_v52, %v1619_v55 }
 0xcc8   :  { %v4398_v21 = vpop.eup %4397  ;;  %v1622_v20 = vmul.f32 %v4396_v27, %v4972_v11  ;;  %v1636_v25 = vadd.f32 %v3384_v58, %v1628_v59 }
 0xcc9   :  { %v1635_v18 = vadd.f32 %v3384_v58, %v1627_v60  ;;  %v1621_v62 = vmul.f32 %v4398_v21, %v4975_v57 }
 0xcca   :  { %v1630_v63 = vmul.f32 %v3383_v52, %v1622_v20 }
 0xccb   :  { %3808 = vmatprep.mubr.msk.f32.mxu0 %vm272_vm1, %v1635_v18  ;;  %v1629_v3 = vmul.f32 %v3383_v52, %v1621_v62 }
 0xccc   :  { %3809 = vmatmul.mubr.msk.f32.vlgmr.msra.gmra.mrb[20].mxu0 %vm272_vm1, %v1636_v25  ;;  %v1638_v24 = vadd.f32 %v3384_v58, %v1630_v63  ;;  %v1939_v63 = vld [vmem:[%s5354_s1 + $0x1a8] sm:$0xff] }
 0xccd   :  { %v1637_v4 = vadd.f32 %v3384_v58, %v1629_v3 }
 0xccf   :  { %3811 = vmatprep.mubr.msk.f32.mxu0 %vm272_vm1, %v1637_v4 }
 0xcd0   :  { %3812 = vmatmul.mubr.msk.f32.gmra.mrb[22].mxu0 %vm272_vm1, %v1638_v24 }
 0xd9f   :  { %v3810_v10 = vpop.f32.mrb[20].mxu0 }
 0xda0   :  { %v1732_v11 = vadd.f32 %v3810_v10, %v3385_v8  ;;  %v1726_v14 = vpop.f32.mrb[21].mxu0 }
 0xda1   :  { %v1727_v57 = vadd.f32 %v3385_v8, %v1726_v14 }
 0xda2   :  { %v1746_v16 = vmax.f32 %v1732_v11, 0.0 }
 0xda3   :  { %v1745_v15 = vmax.f32 %v1727_v57, 0.0  ;;  %v3813_v42 = vpop.f32.mrb[22].mxu0 }
 0xda4   :  { %v1742_v17 = vadd.f32 %v3813_v42, %v3385_v8  ;;  %v1736_v13 = vpop.f32.mrb[23].mxu0 }
 0xda5   :  { %v1737_v61 = vadd.f32 %v3385_v8, %v1736_v13  ;;  %3830 = vmatprep.mubr.msk.f32.mxu1 %vm52_vm0, %v1745_v15 }
 0xda6   :  { %3831 = vmatmul.mubr.msk.f32.vlgmr.msra.gmra.mrb[32].mxu1 %vm52_vm0, %v1746_v16  ;;  %v1748_v22 = vmax.f32 %v1742_v17, 0.0 }
 0xda7   :  { %v1747_v19 = vmax.f32 %v1737_v61, 0.0 }
 0xda9   :  { %3833 = vmatprep.mubr.msk.f32.mxu1 %vm52_vm0, %v1747_v19  ;;  %v3395_v19 = vld [vmem:[%s5356_s2 + $0x27] ss:$0 sm:$0xff] }
 0xdaa   :  { %3834 = vmatmul.mubr.msk.f32.gmra.mrb[34].mxu1 %vm52_vm0, %v1748_v22 }
 0xe79   :  { %v3832_v23 = vpop.f32.mrb[32].mxu1 }
 0xe7a   :  { %v1855_v29 = vadd.f32 %v3832_v23, %v1636_v25  ;;  %v1835_v30 = vpop.f32.mrb[33].mxu1  ;;  %v1938_v25 = vld [vmem:[%s5354_s1 + $0x1a0] sm:$0xff] }
 0xe7b   :  { %v1854_v33 = vadd.f32 %v1835_v30, %v1635_v18  ;;  %v4184_v3 = vpack.c.bf16 %v1939_v63, %v1938_v25 }
 0xe7c   :  { %v1864_v54 = vadd.f32 %v3394_v49, %v1855_v29  ;;  %v3396_v29 = vld [vmem:[%s5356_s2 + $0x28] ss:$0 sm:$0xff] }
 0xe7d   :  { %v3835_v34 = vpop.f32.mrb[34].mxu1  ;;  %v1863_v53 = vadd.f32 %v3394_v49, %v1854_v33  ;;  %4185 = vmatprep.subr.bf16.mxu0 %v4184_v3 }
 0xe7e   :  { %v1857_v35 = vadd.f32 %v3835_v34, %v1638_v24  ;;  %v1845_v36 = vpop.f32.mrb[35].mxu1  ;;  %v1872_v37 = vsel %vm272_vm1, %v1864_v54, 0.0  ;;  %v1941_v24 = vld [vmem:[%s5354_s1 + $0x1b8] sm:$0xff]  ;;  %4187 = vmatpush3.bf16.msra.mxu0 %v4184_v3 }
 0xe7f   :  { %v1856_v41 = vadd.f32 %v1845_v36, %v1637_v4  ;;  %1873 = vadd.xlane.f32.xlu0 %v1872_v37  ;;  %v1869_v44 = vsel %vm272_vm1, %v1863_v53, 0.0  ;;  %v1940_v4 = vld [vmem:[%s5354_s1 + $0x1b0] sm:$0xff] }
 0xe80   :  { %1870 = vadd.xlane.f32.xlu1 %v1869_v44  ;;  %v1866_v1 = vadd.f32 %v3394_v49, %v1857_v35  ;;  %v4188_v5 = vpack.c.bf16 %v1941_v24, %v1940_v4 }
 0xe81   :  { %v1865_v2 = vadd.f32 %v3394_v49, %v1856_v41 }
 0xe82   :  { %v1878_v45 = vsel %vm272_vm1, %v1866_v1, 0.0  ;;  %4189 = vmatprep.subr.bf16.mxu0 %v4188_v5 }
 0xe83   :  { %1879 = vadd.xlane.f32.xlu0 %v1878_v45  ;;  %v1875_v46 = vsel %vm272_vm1, %v1865_v2, 0.0  ;;  %4191 = vmatpush3.bf16.msra.mxu0 %v4188_v5  ;;  %v4437_v45 = vmov 0.0  }
 0xe84   :  { %1876 = vadd.xlane.f32.xlu1 %v1875_v46  ;;  %4192 = vmatprep.subr.bf16.mxu0 %v4433_v0  ;;  %v1943_v46 = vld [vmem:[%s5356_s2 + $0x61] sm:$0xff] }
 0xe85   :  { %3869 = vmatprep.mubr.msk.f32.mxu1 %vm4436_vm3, %v4437_v45 }
 0xf0c   :  { %v1874_v12 = vpop.xlane.xlu0 %1873 }
 0xf0d   :  { %v1882_v40 = vmul.f32 0.03125, %v1874_v12  ;;  %v1871_v51 = vpop.xlane.xlu1 %1870  ;;  %v1942_v12 = vld [vmem:[%s5356_s2 + $0x59] sm:$0xff] }
 0xf0e   :  { %v1881_v9 = vmul.f32 0.03125, %v1871_v51 }
 0xf0f   :  { %v1886_v47 = vsub.f32 %v1864_v54, %v1882_v40 }
 0xf10   :  { %v1885_v50 = vsub.f32 %v1863_v53, %v1881_v9  ;;  %v1880_v43 = vpop.xlane.xlu0 %1879 }
 0xf11   :  { %v1884_v26 = vmul.f32 0.03125, %v1880_v43  ;;  %v1877_v52 = vpop.xlane.xlu1 %1876  ;;  %v1890_v48 = vmul.f32 %v1886_v47, %v1886_v47  ;;  %v1944_v43 = vld [vmem:[%s5356_s2 + $0x69] sm:$0xff] }
 0xf12   :  { %v1883_v28 = vmul.f32 0.03125, %v1877_v52  ;;  %v1889_v55 = vmul.f32 %v1885_v50, %v1885_v50 }
 0xf13   :  { %v1888_v58 = vsub.f32 %v1866_v1, %v1884_v26  ;;  %v1896_v59 = vsel %vm272_vm1, %v1890_v48, 0.0 }
 0xf14   :  { %v1887_v27 = vsub.f32 %v1865_v2, %v1883_v28  ;;  %1897 = vadd.xlane.f32.xlu0 %v1896_v59  ;;  %v1893_v60 = vsel %vm272_vm1, %v1889_v55, 0.0 }
 0xf15   :  { %1894 = vadd.xlane.f32.xlu1 %v1893_v60  ;;  %v1892_v21 = vmul.f32 %v1888_v58, %v1888_v58  ;;  %v5106_v60 = vld [vmem:[%s5356_s2 + $0x51] sm:$0xff] }
 0xf16   :  { %v1891_v20 = vmul.f32 %v1887_v27, %v1887_v27 }
 0xf17   :  { %v1902_v18 = vsel %vm272_vm1, %v1892_v21, 0.0  ;;  %v2045_v21 = vmul.f32 %v5106_v60, %v4647_v38 }
 0xf18   :  { %1903 = vadd.xlane.f32.xlu0 %v1902_v18  ;;  %v1899_v62 = vsel %vm272_vm1, %v1891_v20, 0.0  ;;  %v5117_v18 = vld [vmem:[%s5356_s2 + $0x80] sm:$0xff] }
 0xf19   :  { %1900 = vadd.xlane.f32.xlu1 %v1899_v62 }
 0xfa1   :  { %v1898_v6 = vpop.xlane.xlu0 %1897 }
 0xfa2   :  { %v1906_v7 = vmul.f32 0.03125, %v1898_v6  ;;  %v1895_v8 = vpop.xlane.xlu1 %1894 }
 0xfa3   :  { %v1905_v10 = vmul.f32 0.03125, %v1895_v8 }
 0xfa4   :  { %v1910_v11 = vadd.f32 1e-05, %v1906_v7 }
 0xfa5   :  { %v1909_v14 = vadd.f32 1e-05, %v1905_v10  ;;  %v1904_v57 = vpop.xlane.xlu0 %1903 }
 0xfa6   :  { %4399 = vrsqrt.f32 %v1910_v11  ;;  %v1908_v15 = vmul.f32 0.03125, %v1904_v57  ;;  %v1901_v42 = vpop.xlane.xlu1 %1900 }
 0xfa7   :  { %4401 = vrsqrt.f32 %v1909_v14  ;;  %v1907_v16 = vmul.f32 0.03125, %v1901_v42 }
 0xfa8   :  { %v1912_v17 = vadd.f32 1e-05, %v1908_v15 }
 0xfa9   :  { %v1911_v13 = vadd.f32 1e-05, %v1907_v16 }
 0xfaa   :  { %4403 = vrsqrt.f32 %v1912_v17 }
 0xfab   :  { %4405 = vrsqrt.f32 %v1911_v13 }
 0xfb0   :  { %v4400_v61 = vpop.eup %4399 }
 0xfb1   :  { %v4402_v22 = vpop.eup %4401  ;;  %v1918_v23 = vmul.f32 %v4400_v61, %v1886_v47 }
 0xfb2   :  { %v1917_v49 = vmul.f32 %v4402_v22, %v1885_v50  ;;  %v1945_v50 = vld [vmem:[%s5356_s2 + $0x71] sm:$0xff] }
 0xfb3   :  { %v1926_v30 = vmul.f32 %v3395_v19, %v1918_v23 }
 0xfb4   :  { %v4404_v33 = vpop.eup %4403  ;;  %v1925_v54 = vmul.f32 %v3395_v19, %v1917_v49 }
 0xfb5   :  { %v4406_v34 = vpop.eup %4405  ;;  %v1920_v53 = vmul.f32 %v4404_v33, %v1888_v58  ;;  %v1934_v37 = vadd.f32 %v3396_v29, %v1926_v30 }
 0xfb6   :  { %v1933_v35 = vadd.f32 %v3396_v29, %v1925_v54  ;;  %v1919_v36 = vmul.f32 %v4406_v34, %v1887_v27 }
 0xfb7   :  { %v1928_v41 = vmul.f32 %v3395_v19, %v1920_v53 }
 0xfb8   :  { %3844 = vmatprep.mubr.msk.f32.mxu0 %vm272_vm1, %v1933_v35  ;;  %v1927_v44 = vmul.f32 %v3395_v19, %v1919_v36  ;;  %v2231_v19 = vmul.f32 %v5106_v60, %v4649_v39 }
 0xfb9   :  { %3845 = vmatmul.mubr.msk.f32.vlgmr.msra.gmra.mrb[24].mxu0 %vm272_vm1, %v1934_v37  ;;  %v1936_v2 = vadd.f32 %v3396_v29, %v1928_v41 }
 0xfba   :  { %v1935_v1 = vadd.f32 %v3396_v29, %v1927_v44 }
 0xfbc   :  { %3847 = vmatprep.mubr.msk.f32.mxu0 %vm272_vm1, %v1935_v1 }
 0xfbd   :  { %3848 = vmatmul.mubr.msk.f32.gmra.mrb[26].mxu0 %vm272_vm1, %v1936_v2  ;;  %v2393_v2 = vmul.f32 %v5106_v60, %v4637_v31 }
 0xfbe   :  { %3858 = vmatprep.mubr.msk.f32.mxu0 %vm4436_vm3, %v4437_v45 }
0x108c   :  { %v3846_v40 = vpop.f32.mrb[24].mxu0 }
0x108d   :  { %v2030_v51 = vadd.f32 %v3846_v40, %v1943_v46  ;;  %v2024_v9 = vpop.f32.mrb[25].mxu0 }
0x108e   :  { %v2025_v47 = vadd.f32 %v2024_v9, %v1942_v12 }
0x1090   :  { %v4317_v26 = vpack.i.bf16 %v2030_v51, %v2025_v47  ;;  %v5092_v52 = vpack.c.bf16 %v2030_v51, %v2025_v47  ;;  %v3849_v48 = vpop.f32.mrb[26].mxu0 }
0x1091   :  { %v2040_v28 = vadd.f32 %v3849_v48, %v1945_v50  ;;  %v2034_v55 = vpop.f32.mrb[27].mxu0 }
0x1092   :  { %v2035_v58 = vadd.f32 %v2034_v55, %v1944_v43  ;;  %4195 = vmatpush3.bf16.xpose.msk.msra.mxu0 %vm4685_vm2, %v5092_v52 }
0x1093   :  { %4196 = vmatprep.subr.bf16.mxu0 %v4433_v0 }
0x1094   :  { %v4322_v59 = vpack.i.bf16 %v2040_v28, %v2035_v58  ;;  %v5098_v27 = vpack.c.bf16 %v2040_v28, %v2035_v58 }
0x109a   :  { %4199 = vmatpush3.bf16.xpose.msk.msra.mxu0 %vm4685_vm2, %v5098_v27 }
0x109b   :  { %4214 = vmatprep.subr.bf16.mxu0 %v4433_v0 }
0x10a1   :  { %3859 = vmatmul.mubr.msk.f32.vlgmr.msra.gmra.mrb[28].mxu0 %vm272_vm1, %v2045_v21 }
0x10a2   :  { %3891 = vmatprep.mubr.msk.f32.mxu0 %vm4436_vm3, %v4437_v45 }
0x1174   :  { %v2127_v20 = vpop.f32.mrb[28].mxu0 }
0x1175   :  { %v2131_v62 = vmul.f32 0.35355338, %v2127_v20  ;;  %v3860_v25 = vpop.f32.mrb[29].mxu0 }
0x1177   :  { %v2132_v63 = vadd.f32 %v2131_v62, %v5117_v18  ;;  %v2555_v62 = vmul.f32 %v5106_v60, %v4639_v32 }
0x1179   :  { %v2133_v3 = vsel %vm272_vm1, %v2132_v63, -inf }
0x117a   :  { %2134 = vmax.xlane.f32.xlu1 %v2133_v3 }
0x118b   :  { %4318 = vrot.lane.b32.xlu1 %v4317_v26, %s4434_s28 }
0x1207   :  { %v2135_v4 = vpop.xlane.xlu1 %2134 }
0x1208   :  { %v2136_v24 = vsub.f32 %v2132_v63, %v2135_v4 }
0x120a   :  { %v2137_v5 = vmul.f32 1.442695, %v2136_v24 }
0x120b   :  { %v4319_v6 = vpop.permute.xlu1 %4318 }
0x120c   :  { %4407 = vpow2.f32 %v2137_v5  ;;  %v4321_v7 = vunpack.i.h.bf16 %v4319_v6  ;;  %v4320_v8 = vunpack.i.l.bf16 %v4319_v6 }
0x120e   :  { %v4201_v10 = vpack.c.bf16 %v4321_v7, %v4320_v8 }
0x1210   :  { %4202 = vmatpush3.bf16.msra.mxu1 %v4201_v10  ;;  %4216 = vmatpush3.bf16.msra.mxu0 %v4201_v10 }
0x1211   :  { %4203 = vmatprep.subr.bf16.mxu1 %v4433_v0  ;;  %4217 = vmatprep.subr.bf16.mxu0 %v4433_v0 }
0x1216   :  { %v4408_v11 = vpop.eup %4407 }
0x1217   :  { %v2139_v14 = vsel %vm272_vm1, %v4408_v11, 0.0 }
0x1218   :  { %2140 = vadd.xlane.f32.xlu0 %v2139_v14 }
0x122e   :  { %4323 = vrot.lane.b32.xlu0 %v4322_v59, %s4434_s28 }
0x12a5   :  { %v2141_v57 = vpop.xlane.xlu0 %2140 }
0x12a6   :  { %4409 = vrcp.f32 %v2141_v57 }
0x12a9   :  { %v4324_v15 = vpop.permute.xlu0 %4323 }
0x12aa   :  { %v4326_v42 = vunpack.i.h.bf16 %v4324_v15  ;;  %v4325_v16 = vunpack.i.l.bf16 %v4324_v15 }
0x12ac   :  { %v4204_v17 = vpack.c.bf16 %v4326_v42, %v4325_v16  ;;  %v2719_v42 = vld [vmem:[%s5354_s1 + $0x1d0] sm:$0xff]  ;;  %v2720_v16 = vld [vmem:[%s5354_s1 + $0x1d8] sm:$0xff] }
0x12ae   :  { %4205 = vmatpush3.bf16.msra.mxu1 %v4204_v17  ;;  %4219 = vmatpush3.bf16.msra.mxu0 %v4204_v17 }
0x12af   :  { %4206 = vmatprep.subr.bf16.mxu1 %v4433_v0  ;;  %4220 = vmatprep.subr.bf16.mxu0 %v4433_v0 }
0x12b0   :  { %v4410_v13 = vpop.eup %4409 }
0x12b1   :  { %v2143_v61 = vmul.f32 %v4410_v13, %v4408_v11 }
0x12b3   :  { %3870 = vmatmul.mubr.msk.f32.vlgmr.msra.gmra.mrb[36].mxu1 %vm272_vm1, %v2143_v61 }
0x12b4   :  { %3880 = vmatprep.mubr.msk.f32.mxu1 %vm4436_vm3, %v4437_v45 }
0x12b7   :  { %4209 = vmatpush3.bf16.xpose.msk.msra.mxu1 %vm4685_vm2, %v5092_v52 }
0x12b8   :  { %4210 = vmatprep.subr.bf16.mxu1 %v4433_v0 }
0x12bf   :  { %4213 = vmatpush3.bf16.xpose.msk.msra.mxu1 %vm4685_vm2, %v5098_v27 }
0x12c0   :  { %4228 = vmatprep.subr.bf16.mxu1 %v4433_v0 }
0x12c6   :  { %3881 = vmatmul.mubr.msk.f32.vlgmr.msra.gmra.mrb[38].mxu1 %vm272_vm1, %v2231_v19 }
0x12c7   :  { %4230 = vmatpush3.bf16.msra.mxu1 %v4201_v10  ;;  %3913 = vmatprep.mubr.msk.f32.mxu1 %vm4436_vm3, %v4437_v45 }
0x12c8   :  { %4231 = vmatprep.subr.bf16.mxu1 %v4433_v0 }
0x12cb   :  { %4233 = vmatpush3.bf16.msra.mxu1 %v4204_v17 }
0x12cc   :  { %4234 = vmatprep.subr.bf16.mxu1 %v4433_v0 }
0x1386   :  { %v2225_v22 = vpop.f32.mrb[36].mxu1 }
0x1387   :  { %v3871_v23 = vpop.f32.mrb[37].mxu1  ;;  %v2229_v12 = vmul.f32 %v2225_v22, %v4647_v38 }
0x1388   :  { %v1937_v23 = vld [vmem:[%s5356_s2 + $0x49] sm:$0xff] }
0x1399   :  { %v2301_v49 = vpop.f32.mrb[38].mxu1 }
0x139a   :  { %v2305_v29 = vmul.f32 0.35355338, %v2301_v49  ;;  %v3882_v30 = vpop.f32.mrb[39].mxu1 }
0x139c   :  { %v2306_v33 = vadd.f32 %v2305_v29, %v5117_v18  ;;  %v3426_v29 = vld [vmem:[%s5356_s2 + $0x79] ss:$0 sm:$0xff] }
0x139e   :  { %v2307_v54 = vsel %vm272_vm1, %v2306_v33, -inf }
0x139f   :  { %2308 = vmax.xlane.f32.xlu1 %v2307_v54 }
0x142c   :  { %v2309_v34 = vpop.xlane.xlu1 %2308 }
0x142d   :  { %v2310_v53 = vsub.f32 %v2306_v33, %v2309_v34 }
0x142f   :  { %v2311_v35 = vmul.f32 1.442695, %v2310_v53 }
0x1431   :  { %4411 = vpow2.f32 %v2311_v35 }
0x143b   :  { %v4412_v36 = vpop.eup %4411 }
0x143c   :  { %v2313_v37 = vsel %vm272_vm1, %v4412_v36, 0.0 }
0x143d   :  { %2314 = vadd.xlane.f32.xlu0 %v2313_v37 }
0x14ca   :  { %v2315_v41 = vpop.xlane.xlu0 %2314 }
0x14cb   :  { %4413 = vrcp.f32 %v2315_v41  ;;  %v2826_v41 = vld [vmem:[%s5354_s1 + $0x1e0] sm:$0xff] }
0x14d5   :  { %v4414_v44 = vpop.eup %4413 }
0x14d6   :  { %v2317_v1 = vmul.f32 %v4414_v44, %v4412_v36  ;;  %v2827_v44 = vld [vmem:[%s5354_s1 + $0x1e8] sm:$0xff] }
0x14d8   :  { %3892 = vmatmul.mubr.msk.f32.vlgmr.msra.gmra.mrb[30].mxu0 %vm272_vm1, %v2317_v1  ;;  %v4255_v1 = vpack.c.bf16 %v2827_v44, %v2826_v41  ;;  %v3050_v41 = vld [vmem:[%s5354_s1 + $0x258] sm:$0xff] }
0x14d9   :  { %4223 = vmatpush3.bf16.xpose.msk.msra.mxu0 %vm4685_vm2, %v5092_v52  ;;  %3902 = vmatprep.mubr.msk.f32.mxu0 %vm4436_vm3, %v4437_v45 }
0x14da   :  { %4224 = vmatprep.subr.bf16.mxu0 %v4433_v0 }
0x14e1   :  { %4227 = vmatpush3.bf16.xpose.msk.msra.mxu0 %vm4685_vm2, %v5098_v27 }
0x14e2   :  { %4242 = vmatprep.subr.bf16.mxu0 %v4433_v0 }
0x14e8   :  { %3903 = vmatmul.mubr.msk.f32.vlgmr.msra.gmra.mrb[32].mxu0 %vm272_vm1, %v2393_v2  ;;  %v2828_v2 = vld [vmem:[%s5354_s1 + $0x1f0] sm:$0xff] }
0x14e9   :  { %4244 = vmatpush3.bf16.msra.mxu0 %v4201_v10  ;;  %3935 = vmatprep.mubr.msk.f32.mxu0 %vm4436_vm3, %v4437_v45 }
0x14ea   :  { %4245 = vmatprep.subr.bf16.mxu0 %v4433_v0 }
0x14ed   :  { %4247 = vmatpush3.bf16.msra.mxu0 %v4204_v17  ;;  %v4252_v17 = vpack.c.bf16 %v2720_v16, %v2719_v42 }
0x14ee   :  { %4248 = vmatprep.subr.bf16.mxu0 %v4433_v0 }
0x15ab   :  { %v2387_v46 = vpop.f32.mrb[30].mxu0 }
0x15ac   :  { %v2391_v40 = vmul.f32 %v2387_v46, %v4649_v39  ;;  %v3893_v51 = vpop.f32.mrb[31].mxu0  ;;  %v2829_v46 = vld [vmem:[%s5354_s1 + $0x1f8] sm:$0xff] }
0x15ad   :  { %v2910_v51 = vld [vmem:[%s5354_s1 + $0x208] sm:$0xff] }
0x15ae   :  { %v2392_v9 = vadd.f32 %v2391_v40, %v2229_v12  ;;  %v4258_v12 = vpack.c.bf16 %v2829_v46, %v2828_v2  ;;  %v2909_v40 = vld [vmem:[%s5354_s1 + $0x200] sm:$0xff] }
0x15bb   :  { %v2463_v47 = vpop.f32.mrb[32].mxu0 }
0x15bc   :  { %v2467_v50 = vmul.f32 0.35355338, %v2463_v47  ;;  %v3904_v43 = vpop.f32.mrb[33].mxu0  ;;  %v4261_v47 = vpack.c.bf16 %v2910_v51, %v2909_v40  ;;  %v3435_v40 = vld [vmem:[%s5356_s2 + $0x88] ss:$0 sm:$0xff] }
0x15be   :  { %v2468_v26 = vadd.f32 %v2467_v50, %v5117_v18  ;;  %v2912_v50 = vld [vmem:[%s5354_s1 + $0x218] sm:$0xff] }
0x15c0   :  { %v2469_v48 = vsel %vm272_vm1, %v2468_v26, -inf }
0x15c1   :  { %2470 = vmax.xlane.f32.xlu1 %v2469_v48  ;;  %v2914_v48 = vld [vmem:[%s5354_s1 + $0x228] sm:$0xff] }
0x164e   :  { %v2471_v28 = vpop.xlane.xlu1 %2470 }
0x164f   :  { %v2472_v55 = vsub.f32 %v2468_v26, %v2471_v28  ;;  %v2913_v26 = vld [vmem:[%s5354_s1 + $0x220] sm:$0xff] }
0x1650   :  { %v4267_v28 = vpack.c.bf16 %v2914_v48, %v2913_v26  ;;  %v3131_v26 = vld [vmem:[%s5354_s1 + $0x268] sm:$0xff]  ;;  %v3132_v48 = vld [vmem:[%s5354_s1 + $0x270] sm:$0xff] }
0x1651   :  { %v2473_v58 = vmul.f32 1.442695, %v2472_v55 }
0x1653   :  { %4415 = vpow2.f32 %v2473_v58 }
0x165d   :  { %v4416_v59 = vpop.eup %4415 }
0x165e   :  { %v2475_v21 = vsel %vm272_vm1, %v4416_v59, 0.0 }
0x165f   :  { %2476 = vadd.xlane.f32.xlu0 %v2475_v21 }
0x16ec   :  { %v2477_v38 = vpop.xlane.xlu0 %2476 }
0x16ed   :  { %4417 = vrcp.f32 %v2477_v38  ;;  %v3427_v38 = vld [vmem:[%s5356_s2 + $0x7a] ss:$0 sm:$0xff] }
0x16f7   :  { %v4418_v39 = vpop.eup %4417 }
0x16f8   :  { %v2479_v20 = vmul.f32 %v4418_v39, %v4416_v59 }
0x16fa   :  { %3914 = vmatmul.mubr.msk.f32.vlgmr.msra.gmra.mrb[40].mxu1 %vm272_vm1, %v2479_v20  ;;  %v3428_v20 = vld [vmem:[%s5356_s2 + $0x7b] ss:$0 sm:$0xff] }
0x16fb   :  { %4237 = vmatpush3.bf16.xpose.msk.msra.mxu1 %vm4685_vm2, %v5092_v52  ;;  %3924 = vmatprep.mubr.msk.f32.mxu1 %vm4436_vm3, %v4437_v45 }
0x16fc   :  { %4238 = vmatprep.subr.bf16.mxu1 %v4433_v0 }
0x1703   :  { %4241 = vmatpush3.bf16.xpose.msk.msra.mxu1 %vm4685_vm2, %v5098_v27 }
0x1704   :  { %4254 = vmatprep.subr.bf16.mxu1 %v4433_v0 }
0x170a   :  { %3925 = vmatmul.mubr.msk.f32.vlgmr.msra.gmra.mrb[42].mxu1 %vm272_vm1, %v2555_v62 }
0x170b   :  { %3957 = vmatprep.mubr.msk.f32.mxu1 %vm4436_vm3, %v4437_v45  ;;  %4256 = vmatpush3.bf16.msra.mxu1 %v4255_v1 }
0x170c   :  { %4257 = vmatprep.subr.bf16.mxu1 %v4433_v0 }
0x170f   :  { %4259 = vmatpush3.bf16.msra.mxu1 %v4258_v12 }
0x1710   :  { %4272 = vmatprep.subr.bf16.mxu1 %v4433_v0 }
0x17cd   :  { %v2549_v52 = vpop.f32.mrb[40].mxu1 }
0x17ce   :  { %v2553_v25 = vmul.f32 %v2549_v52, %v4637_v31  ;;  %v3915_v63 = vpop.f32.mrb[41].mxu1  ;;  %v2717_v31 = vld [vmem:[%s5354_s1 + $0x1c0] sm:$0xff] }
0x17cf   :  { %v2916_v63 = vld [vmem:[%s5354_s1 + $0x238] sm:$0xff] }
0x17d0   :  { %v2554_v3 = vadd.f32 %v2553_v25, %v2392_v9  ;;  %v2911_v9 = vld [vmem:[%s5354_s1 + $0x210] sm:$0xff] }
0x17d1   :  { %v4264_v43 = vpack.c.bf16 %v2912_v50, %v2911_v9  ;;  %v2915_v25 = vld [vmem:[%s5354_s1 + $0x230] sm:$0xff]  ;;  %v3436_v9 = vld [vmem:[%s5356_s2 + $0x89] ss:$0 sm:$0xff] }
0x17dd   :  { %v2625_v4 = vpop.f32.mrb[42].mxu1 }
0x17de   :  { %v2629_v24 = vmul.f32 0.35355338, %v2625_v4  ;;  %v3926_v5 = vpop.f32.mrb[43].mxu1  ;;  %v3429_v4 = vld [vmem:[%s5356_s2 + $0x7c] ss:$0 sm:$0xff] }
0x17e0   :  { %v2630_v56 = vadd.f32 %v2629_v24, %v5117_v18  ;;  %v2718_v18 = vld [vmem:[%s5354_s1 + $0x1c8] sm:$0xff] }
0x17e1   :  { %v4249_v57 = vpack.c.bf16 %v2718_v18, %v2717_v31 }
0x17e2   :  { %v2631_v27 = vsel %vm272_vm1, %v2630_v56, -inf }
0x17e3   :  { %2632 = vmax.xlane.f32.xlu1 %v2631_v27 }
0x1870   :  { %v2633_v6 = vpop.xlane.xlu1 %2632 }
0x1871   :  { %v2634_v60 = vsub.f32 %v2630_v56, %v2633_v6 }
0x1873   :  { %v2635_v7 = vmul.f32 1.442695, %v2634_v60  ;;  %v3432_v60 = vld [vmem:[%s5356_s2 + $0x7d] ss:$0 sm:$0xff] }
0x1875   :  { %4419 = vpow2.f32 %v2635_v7 }
0x187f   :  { %v4420_v8 = vpop.eup %4419 }
0x1880   :  { %v2637_v10 = vsel %vm272_vm1, %v4420_v8, 0.0 }
0x1881   :  { %2638 = vadd.xlane.f32.xlu0 %v2637_v10 }
0x190e   :  { %v2639_v11 = vpop.xlane.xlu0 %2638 }
0x190f   :  { %4421 = vrcp.f32 %v2639_v11 }
0x1919   :  { %v4422_v14 = vpop.eup %4421 }
0x191a   :  { %v2641_v15 = vmul.f32 %v4422_v14, %v4420_v8 }
0x191c   :  { %3936 = vmatmul.mubr.msk.f32.vlgmr.msra.gmra.mrb[34].mxu0 %vm272_vm1, %v2641_v15 }
0x191d   :  { %4250 = vmatpush3.bf16.msra.mxu0 %v4249_v57  ;;  %3946 = vmatprep.mubr.msk.f32.mxu0 %vm4436_vm3, %v4437_v45 }
0x191e   :  { %4251 = vmatprep.subr.bf16.mxu0 %v4433_v0 }
0x1921   :  { %4253 = vmatpush3.bf16.msra.mxu0 %v4252_v17 }
0x1922   :  { %4260 = vmatprep.subr.bf16.mxu0 %v4433_v0 }
0x19ef   :  { %v2711_v13 = vpop.f32.mrb[34].mxu0 }
0x19f0   :  { %v2715_v61 = vmul.f32 %v2711_v13, %v4639_v32  ;;  %v3937_v19 = vpop.f32.mrb[35].mxu0 }
0x19f2   :  { %v2716_v22 = vadd.f32 %v2715_v61, %v2554_v3  ;;  %v4270_v3 = vpack.c.bf16 %v2916_v63, %v2915_v25  ;;  %v3433_v61 = vld [vmem:[%s5356_s2 + $0x7e] ss:$0 sm:$0xff]  ;;  %v3217_v63 = vld [vmem:[%s5354_s1 + $0x290] sm:$0xff] }
0x19f4   :  { %3947 = vmatmul.mubr.msk.f32.vlgmr.msra.gmra.mrb[36].mxu0 %vm272_vm1, %v2716_v22  ;;  %v3434_v22 = vld [vmem:[%s5356_s2 + $0x7f] ss:$0 sm:$0xff] }
0x19f5   :  { %3976 = vmatprep.mubr.msk.f32.mxu0 %vm4436_vm3, %v4437_v45  ;;  %4262 = vmatpush3.bf16.msra.mxu0 %v4261_v47 }
0x19f6   :  { %4263 = vmatprep.subr.bf16.mxu0 %v4433_v0 }
0x19f9   :  { %4265 = vmatpush3.bf16.msra.mxu0 %v4264_v43  ;;  %v3130_v43 = vld [vmem:[%s5354_s1 + $0x260] sm:$0xff] }
0x19fa   :  { %4266 = vmatprep.subr.bf16.mxu0 %v4433_v0 }
0x19fd   :  { %4268 = vmatpush3.bf16.msra.mxu0 %v4267_v28  ;;  %v4279_v28 = vpack.c.bf16 %v3131_v26, %v3130_v43 }
0x19fe   :  { %4269 = vmatprep.subr.bf16.mxu0 %v4433_v0 }
0x1a01   :  { %4271 = vmatpush3.bf16.msra.mxu0 %v4270_v3 }
0x1a02   :  { %4284 = vmatprep.subr.bf16.mxu0 %v4433_v0 }
0x1ac7   :  { %v2790_v49 = vpop.f32.mrb[36].mxu0 }
0x1ac8   :  { %v2794_v30 = vadd.f32 %v2790_v49, %v1937_v23  ;;  %v3948_v33 = vpop.f32.mrb[37].mxu0 }
0x1aca   :  { %v2800_v54 = vadd.f32 %v3426_v29, %v2794_v30 }
0x1acc   :  { %v2803_v32 = vsel %vm272_vm1, %v2800_v54, 0.0 }
0x1acd   :  { %2804 = vadd.xlane.f32.xlu1 %v2803_v32 }
0x1b5a   :  { %v2805_v34 = vpop.xlane.xlu1 %2804 }
0x1b5b   :  { %v2806_v53 = vmul.f32 0.03125, %v2805_v34 }
0x1b5d   :  { %v2807_v35 = vsub.f32 %v2800_v54, %v2806_v53  ;;  %v3047_v53 = vld [vmem:[%s5354_s1 + $0x240] sm:$0xff] }
0x1b5f   :  { %v2808_v36 = vmul.f32 %v2807_v35, %v2807_v35 }
0x1b61   :  { %v2809_v37 = vsel %vm272_vm1, %v2808_v36, 0.0 }
0x1b62   :  { %2810 = vadd.xlane.f32.xlu0 %v2809_v37  ;;  %v3049_v37 = vld [vmem:[%s5354_s1 + $0x250] sm:$0xff] }
0x1b63   :  { %v4276_v44 = vpack.c.bf16 %v3050_v41, %v3049_v37 }
0x1bef   :  { %v2811_v55 = vpop.xlane.xlu0 %2810 }
0x1bf0   :  { %v2812_v58 = vmul.f32 0.03125, %v2811_v55  ;;  %v3133_v55 = vld [vmem:[%s5354_s1 + $0x278] sm:$0xff] }
0x1bf2   :  { %v2813_v59 = vadd.f32 1e-05, %v2812_v58  ;;  %v4282_v58 = vpack.c.bf16 %v3133_v55, %v3132_v48 }
0x1bf4   :  { %4423 = vrsqrt.f32 %v2813_v59  ;;  %v3216_v59 = vld [vmem:[%s5354_s1 + $0x288] sm:$0xff] }
0x1bfe   :  { %v4424_v21 = vpop.eup %4423 }
0x1bff   :  { %v2815_v39 = vmul.f32 %v4424_v21, %v2807_v35  ;;  %v3048_v35 = vld [vmem:[%s5354_s1 + $0x248] sm:$0xff] }
0x1c00   :  { %v4273_v36 = vpack.c.bf16 %v3048_v35, %v3047_v53 }
0x1c01   :  { %v2820_v62 = vmul.f32 %v3427_v38, %v2815_v39  ;;  %v3437_v38 = vld [vmem:[%s5356_s2 + $0x8a] ss:$0 sm:$0xff] }
0x1c03   :  { %v2825_v52 = vadd.f32 %v3428_v20, %v2820_v62 }
0x1c05   :  { %3958 = vmatmul.mubr.msk.f32.vlgmr.msra.gmra.mrb[44].mxu1 %vm272_vm1, %v2825_v52 }
0x1c06   :  { %3987 = vmatprep.mubr.msk.f32.mxu1 %vm4436_vm3, %v4437_v45  ;;  %4274 = vmatpush3.bf16.msra.mxu1 %v4273_v36 }
0x1c07   :  { %4275 = vmatprep.subr.bf16.mxu1 %v4433_v0 }
0x1c0a   :  { %4277 = vmatpush3.bf16.msra.mxu1 %v4276_v44 }
0x1c0b   :  { %4278 = vmatprep.subr.bf16.mxu1 %v4433_v0 }
0x1cd8   :  { %v2904_v24 = vpop.f32.mrb[44].mxu1 }
0x1cd9   :  { %v2905_v5 = vadd.f32 %v3429_v4, %v2904_v24  ;;  %v3959_v56 = vpop.f32.mrb[45].mxu1  ;;  %v3439_v4 = vld [vmem:[%s5356_s2 + $0x8b] ss:$0 sm:$0xff] }
0x1cdb   :  { %v2908_v27 = vmax.f32 %v2905_v5, 0.0 }
0x1cdd   :  { %3977 = vmatmul.mubr.msk.f32.vlgmr.msra.gmra.mrb[38].mxu0 %vm52_vm0, %v2908_v27 }
0x1cde   :  { %4009 = vmatprep.mubr.msk.f32.mxu0 %vm4436_vm3, %v4437_v45 }
0x1db0   :  { %v2986_v6 = vpop.f32.mrb[38].mxu0 }
0x1db1   :  { %v2990_v7 = vadd.f32 %v2986_v6, %v2825_v52  ;;  %v3978_v8 = vpop.f32.mrb[39].mxu0  ;;  %v3441_v6 = vld [vmem:[%s5356_s2 + $0x8c] ss:$0 sm:$0xff] }
0x1db3   :  { %v2996_v10 = vadd.f32 %v3432_v60, %v2990_v7 }
0x1db5   :  { %v2999_v11 = vsel %vm272_vm1, %v2996_v10, 0.0 }
0x1db6   :  { %3000 = vadd.xlane.f32.xlu1 %v2999_v11 }
0x1e43   :  { %v3001_v31 = vpop.xlane.xlu1 %3000 }
0x1e44   :  { %v3002_v18 = vmul.f32 0.03125, %v3001_v31 }
0x1e46   :  { %v3003_v14 = vsub.f32 %v2996_v10, %v3002_v18 }
0x1e48   :  { %v3004_v57 = vmul.f32 %v3003_v14, %v3003_v14 }
0x1e4a   :  { %v3005_v15 = vsel %vm272_vm1, %v3004_v57, 0.0 }
0x1e4b   :  { %3006 = vadd.xlane.f32.xlu0 %v3005_v15 }
0x1ed8   :  { %v3007_v42 = vpop.xlane.xlu0 %3006 }
0x1ed9   :  { %v3008_v16 = vmul.f32 0.03125, %v3007_v42 }
0x1edb   :  { %v3009_v17 = vadd.f32 1e-05, %v3008_v16 }
0x1edd   :  { %4425 = vrsqrt.f32 %v3009_v17 }
0x1ee7   :  { %v4426_v13 = vpop.eup %4425 }
0x1ee8   :  { %v3011_v19 = vmul.f32 %v4426_v13, %v3003_v14 }
0x1eea   :  { %v3016_v23 = vmul.f32 %v3433_v61, %v3011_v19 }
0x1eec   :  { %v3021_v49 = vadd.f32 %v3434_v22, %v3016_v23 }
0x1eee   :  { %v3024_v29 = vsel %vm272_vm1, %v3021_v49, 0.0 }
0x1eef   :  { %3025 = vadd.xlane.f32.xlu1 %v3024_v29 }
0x1f7c   :  { %v3026_v30 = vpop.xlane.xlu1 %3025 }
0x1f7d   :  { %v3027_v33 = vmul.f32 0.03125, %v3026_v30 }
0x1f7f   :  { %v3028_v54 = vsub.f32 %v3021_v49, %v3027_v33 }
0x1f81   :  { %v3029_v32 = vmul.f32 %v3028_v54, %v3028_v54 }
0x1f83   :  { %v3030_v34 = vsel %vm272_vm1, %v3029_v32, 0.0 }
0x1f84   :  { %3031 = vadd.xlane.f32.xlu0 %v3030_v34 }
0x2011   :  { %v3032_v1 = vpop.xlane.xlu0 %3031 }
0x2012   :  { %v3033_v2 = vmul.f32 0.03125, %v3032_v1 }
0x2014   :  { %v3034_v46 = vadd.f32 1e-05, %v3033_v2 }
0x2016   :  { %4427 = vrsqrt.f32 %v3034_v46 }
0x2020   :  { %v4428_v12 = vpop.eup %4427 }
0x2021   :  { %v3036_v51 = vmul.f32 %v4428_v12, %v3028_v54 }
0x2023   :  { %v3041_v47 = vmul.f32 %v3435_v40, %v3036_v51 }
0x2025   :  { %v3046_v50 = vadd.f32 %v3436_v9, %v3041_v47 }
0x2027   :  { %3988 = vmatmul.mubr.msk.f32.vlgmr.msra.gmra.mrb[46].mxu1 %vm272_vm1, %v3046_v50 }
0x2028   :  { %3998 = vmatprep.mubr.msk.f32.mxu1 %vm4436_vm3, %v4437_v45  ;;  %4280 = vmatpush3.bf16.msra.mxu1 %v4279_v28  ;;  %v3215_v45 = vld [vmem:[%s5354_s1 + $0x280] sm:$0xff] }
0x2029   :  { %4281 = vmatprep.subr.bf16.mxu1 %v4433_v0  ;;  %v4285_v21 = vpack.c.bf16 %v3216_v59, %v3215_v45 }
0x202b   :  { %4286 = vmatpush3.bf16.msra.mxu0 %v4285_v21 }
0x202c   :  { %4283 = vmatpush3.bf16.msra.mxu1 %v4282_v58  ;;  %4287 = vmatprep.subr.bf16.mxu0 %v4433_v0  ;;  %v3218_v0 = vld [vmem:[%s5354_s1 + $0x298] sm:$0xff]  ;;  %s4439_s1 = smov 16  }
0x202d   :  { %v4288_v3 = vpack.c.bf16 %v3218_v0, %v3217_v63 }
0x202f   :  { %4289 = vmatpush3.bf16.msra.mxu0 %v4288_v3 }
0x20fa   :  { %v3125_v39 = vpop.f32.mrb[46].mxu1 }
0x20fb   :  { %v3126_v20 = vadd.f32 %v3437_v38, %v3125_v39  ;;  %v3989_v62 = vpop.f32.mrb[47].mxu1 }
0x20fd   :  { %v3129_v52 = vmax.f32 %v3126_v20, 0.0 }
0x20ff   :  { %3140 = vrot.lane.b32.xlu1 %v3129_v52, %s4438_s16 }
0x2171   :  { %v3141_v25 = vpop.permute.xlu1 %3140 }
0x2172   :  { %3999 = vmatmul.mubr.msk.f32.vlgmr.msra.gmra.mrb[48].mxu1 %vm272_vm1, %v3141_v25 }
0x2245   :  { %v3210_v24 = vpop.f32.mrb[48].mxu1 }
0x2246   :  { %v3211_v5 = vadd.f32 %v3439_v4, %v3210_v24  ;;  %v4000_v56 = vpop.f32.mrb[49].mxu1 }
0x2248   :  { %v3214_v27 = vmax.f32 %v3211_v5, 0.0 }
0x224a   :  { %4010 = vmatmul.mubr.msk.f32.vlgmr.msra.gmra.mrb[40].mxu0 %vm272_vm1, %v3214_v27 }
0x231d   :  { %v3293_v60 = vpop.f32.mrb[40].mxu0 }
0x231e   :  { %v3294_v7 = vadd.f32 %v3441_v6, %v3293_v60  ;;  %v4011_v8 = vpop.f32.mrb[41].mxu0 }
0x2320   :  { %v3443_v10 = vmul.f32 -1.442695, %v3294_v7 }
0x2322   :  { %4429 = vpow2.f32 %v3443_v10 }
0x232c   :  { %v4430_v11 = vpop.eup %4429 }
0x232d   :  { %v3300_v31 = vadd.f32 1.0, %v4430_v11 }
0x232f   :  { %4431 = vrcp.f32 %v3300_v31 }
0x2339   :  { %v4432_v18 = vpop.eup %4431 }
0x233a   :  { %3304 = vrot.lane.b32.xlu0 %v4432_v18, %s4439_s1 }
0x23ac   :  { %v3305_v14 = vpop.permute.xlu0 %3304 }
0x23ad   :  { %v3308_v57 = vsel %vm3307_vm4, %v3126_v20, %v3305_v14 }
0x23ae   :  { %v3310_v15 = vsel %vm3309_vm5, %v3308_v57, 0.0 }
0x23af   :  { %3311 = vst [vmem:[%s5357_s3] sm:$0xff] %v3310_v15 }

</bundles_post_ra>
